<compile_context>
chip_gen: v7x
topology: tpu7x:2x2x1
jax: 0.10.0
libtpu: 0.0.40
codegen_flags: <defaults>
</compile_context>

<pallas_src>
import jax
import jax.numpy as jnp
from jax.experimental import pallas as pl
from jax.experimental.pallas import tpu as pltpu

# ---------------- model dims (match the PyTorch module defaults) -------------
EMBED_DIM = 8
LSTM_HIDDEN = 64
ENV_HIDDEN = 16
ENV_EMBED_DIM = 8
FC_HIDDEN = 32
NUM_MOVES = 6
ENV_IN = 9

# ---------------- TPU layout constants ---------------------------------------
GATE_PAD = 128          # each LSTM gate padded to one full 128-lane group
OUT_PAD = 128           # lane-dense output head (logits live in [:, :NUM_MOVES])

# small example shapes
BATCH = 2
SEQ = 8

# place PyTorch gate blocks (i, f, g, o) into padded slots (i, f, o, g) so the
# three sigmoid gates are contiguous and g sits in the last 128-lane group.
_GATE_PERM = (0, 1, 3, 2)


# ------------------------------- kernel --------------------------------------
def vip_kernel(
    moves_ref,   # (T*B_TILE, 1)          int32, T-major per tile
    env_ref,     # (B_TILE, ENV_IN)       f32
    table_ref,   # (NUM_MOVES, 4*GATE_PAD) bf16  fused emb@W_ih^T + (b_ih+b_hh)
    w_hh_ref,    # (GATE_PAD, 4*GATE_PAD) bf16  gate-padded recurrent weights
    w_e1_ref,    # (ENV_IN, ENV_HIDDEN)   f32
    b_e1_ref,    # (1, ENV_HIDDEN)
    w_e2_ref,    # (ENV_HIDDEN, ENV_EMBED_DIM)
    b_e2_ref,    # (1, ENV_EMBED_DIM)
    w_ch_ref,    # (GATE_PAD, FC_HIDDEN)      fc_comb weight, h part (rows padded)
    w_ce_ref,    # (ENV_EMBED_DIM, FC_HIDDEN) fc_comb weight, env part
    b_c_ref,     # (1, FC_HIDDEN)
    w_o_ref,     # (FC_HIDDEN, OUT_PAD)
    b_o_ref,     # (1, OUT_PAD)
    out_ref,     # (B_TILE, OUT_PAD)
):
    TB = moves_ref.shape[0]           # T * B
    B = env_ref.shape[0]
    T = TB // B
    NM = table_ref.shape[0]
    HP = w_hh_ref.shape[0]            # padded per-gate width (128)

    table = table_ref[...]            # (NM, 4*HP) bf16
    w_hh = w_hh_ref[...]              # (HP, 4*HP) bf16

    # ---- one-hot embedding + fused input projection for ALL T steps --------
    # (single matmul, off the serial recurrence; rows are T-major so step t is
    #  the 8-aligned sublane slice [t*B:(t+1)*B]).
    moves_col = moves_ref[...]                                        # (T*B, 1)
    iota_nm = jax.lax.broadcasted_iota(jnp.int32, (TB, NM), 1)
    onehot = (moves_col == iota_nm).astype(table.dtype)               # (T*B, NM)
    xg_all = jnp.dot(onehot, table,
                     preferred_element_type=jnp.float32)              # (T*B, 4*HP)

    h = jnp.zeros((B, HP), jnp.float32)
    c = jnp.zeros((B, HP), jnp.float32)

    # ---- LSTM recurrence, fully unrolled (T is a static trace constant) ----
    # padded gate slot order: (i, f, o, g), each HP lanes wide.
    for t in range(T):
        gates = xg_all[t * B:(t + 1) * B, :] + jnp.dot(
            h.astype(w_hh.dtype), w_hh, preferred_element_type=jnp.float32)

        i_g = jax.nn.sigmoid(gates[:, 0 * HP:1 * HP])
        f_g = jax.nn.sigmoid(gates[:, 1 * HP:2 * HP])
        o_g = jax.nn.sigmoid(gates[:, 2 * HP:3 * HP])
        g_g = jnp.tanh(gates[:, 3 * HP:4 * HP])

        c = f_g * c + i_g * g_g
        h = o_g * jnp.tanh(c)
        # padded columns of h/c provably stay zero (zero weights & bias there).

    # ---- env MLP ----
    env = env_ref[...]
    e1 = jnp.maximum(
        jnp.dot(env, w_e1_ref[...], preferred_element_type=jnp.float32)
        + b_e1_ref[...], 0.0)
    e2 = jnp.maximum(
        jnp.dot(e1, w_e2_ref[...], preferred_element_type=jnp.float32)
        + b_e2_ref[...], 0.0)                                     # (B, ENV_EMBED)

    # ---- fc_comb on concat([h, env]) expressed as split matmuls ----
    comb = jnp.maximum(
        jnp.dot(h, w_ch_ref[...], preferred_element_type=jnp.float32)
        + jnp.dot(e2, w_ce_ref[...], preferred_element_type=jnp.float32)
        + b_c_ref[...], 0.0)                                      # (B, FC_HIDDEN)

    # ---- output head (lane-dense 128-wide store) ----
    out_ref[...] = (
        jnp.dot(comb, w_o_ref[...], preferred_element_type=jnp.float32)
        + b_o_ref[...]
    )


# ------------------------------- wrapper --------------------------------------
def _pad_gate_cols(w, h, hp):
    """(rows, 4*h) gate-ordered (i,f,g,o) -> (rows, 4*hp) in slot order (i,f,o,g),
    each gate block at an hp-aligned lane offset, padded columns exactly zero."""
    rows = w.shape[0]
    out = jnp.zeros((rows, 4 * hp), jnp.float32)
    for slot, src in enumerate(_GATE_PERM):
        out = out.at[:, slot * hp: slot * hp + h].set(w[:, src * h:(src + 1) * h])
    return out


def _pick_b_tile(batch):
    """Tiny batches: 8 rows (single tile).  Real batches: big tiles (<=128) for
    MXU row fill, but >=2 tiles so v7x's two TensorCores both get work."""
    if batch <= 8:
        return 8
    half = (batch + 1) // 2
    bt = ((half + 7) // 8) * 8
    return min(128, bt)


@jax.jit
def vip_movement_predictor(env_input, moves_seq, params):
    """env_input: (B, 9) f32, moves_seq: (B, T) int32 -> (B, NUM_MOVES) f32."""
    B, T = moves_seq.shape
    H, HP = LSTM_HIDDEN, GATE_PAD
    b_tile = _pick_b_tile(B)
    n_tiles = pl.cdiv(B, b_tile)
    B_pad = n_tiles * b_tile

    # pad batch to a multiple of the tile (pad rows discarded at the end)
    moves_p = jnp.zeros((B_pad, T), jnp.int32).at[:B].set(moves_seq.astype(jnp.int32))
    env_p = jnp.zeros((B_pad, ENV_IN), jnp.float32).at[:B].set(
        env_input.astype(jnp.float32))

    # layout plumbing: per-tile T-major flatten of the move ids so the kernel's
    # one-hot rows for step t are a contiguous 8-aligned sublane slice.
    moves_tm = (moves_p.reshape(n_tiles, b_tile, T)
                .transpose(0, 2, 1)
                .reshape(n_tiles * T * b_tile, 1))

    # fused embedding + LSTM input projection + combined bias
    # (exact: each one-hot row sums to 1; move ids must be in [0, NUM_MOVES))
    table = (params["emb"] @ params["w_ih"].T
             + (params["b_ih"] + params["b_hh"])[None, :])        # (NM, 4H)
    table_p = _pad_gate_cols(table, H, HP).astype(jnp.bfloat16)   # (NM, 4*HP) bf16

    w_hh_p = jnp.zeros((HP, 4 * HP), jnp.float32).at[:H].set(
        _pad_gate_cols(params["w_hh"].T, H, HP)).astype(jnp.bfloat16)

    w_ch_p = jnp.zeros((HP, FC_HIDDEN), jnp.float32).at[:H].set(
        params["w_comb"][:, :H].T)                                # (HP, FC_HIDDEN)
    w_ce = params["w_comb"][:, H:].T                              # (ENV_EMBED, FC_HIDDEN)

    w_o_p = jnp.zeros((FC_HIDDEN, OUT_PAD), jnp.float32).at[:, :NUM_MOVES].set(
        params["w_out"].T)
    b_o_p = jnp.zeros((1, OUT_PAD), jnp.float32).at[:, :NUM_MOVES].set(
        params["b_out"][None, :])

    args = (
        moves_tm, env_p, table_p, w_hh_p,
        params["w_env1"].T, params["b_env1"].reshape(1, -1),
        params["w_env2"].T, params["b_env2"].reshape(1, -1),
        w_ch_p, w_ce, params["b_comb"].reshape(1, -1),
        w_o_p, b_o_p,
    )

    tile = lambda b: (b, 0)     # per-batch-tile blocks
    full = lambda b: (0, 0)     # broadcast weight blocks
    in_specs = [
        pl.BlockSpec((T * b_tile, 1), tile),             # moves, T-major column
        pl.BlockSpec((b_tile, ENV_IN), tile),            # env
        pl.BlockSpec((NUM_MOVES, 4 * HP), full),         # fused table (bf16)
        pl.BlockSpec((HP, 4 * HP), full),                # w_hh (bf16)
        pl.BlockSpec((ENV_IN, ENV_HIDDEN), full),
        pl.BlockSpec((1, ENV_HIDDEN), full),
        pl.BlockSpec((ENV_HIDDEN, ENV_EMBED_DIM), full),
        pl.BlockSpec((1, ENV_EMBED_DIM), full),
        pl.BlockSpec((HP, FC_HIDDEN), full),
        pl.BlockSpec((ENV_EMBED_DIM, FC_HIDDEN), full),
        pl.BlockSpec((1, FC_HIDDEN), full),
        pl.BlockSpec((FC_HIDDEN, OUT_PAD), full),
        pl.BlockSpec((1, OUT_PAD), full),
    ]

    out = pl.pallas_call(
        vip_kernel,
        out_shape=jax.ShapeDtypeStruct((B_pad, OUT_PAD), jnp.float32),
        grid=(n_tiles,),
        in_specs=in_specs,
        out_specs=pl.BlockSpec((b_tile, OUT_PAD), tile),
        compiler_params=pltpu.CompilerParams(
            dimension_semantics=("parallel",),   # v7x: batch tiles split over TCs
        ),
    )(*args)

    return out[:B, :NUM_MOVES]


# ------------------------- pure-JAX reference ---------------------------------
def vip_reference(env_input, moves_seq, params):
    B, T = moves_seq.shape
    H = LSTM_HIDDEN
    emb = params["emb"][moves_seq]                               # (B, T, E)
    h = jnp.zeros((B, H), jnp.float32)
    c = jnp.zeros((B, H), jnp.float32)
    for t in range(T):
        gates = (emb[:, t] @ params["w_ih"].T + params["b_ih"]
                 + h @ params["w_hh"].T + params["b_hh"])
        i_g = jax.nn.sigmoid(gates[:, 0:H])
        f_g = jax.nn.sigmoid(gates[:, H:2 * H])
        g_g = jnp.tanh(gates[:, 2 * H:3 * H])
        o_g = jax.nn.sigmoid(gates[:, 3 * H:4 * H])
        c = f_g * c + i_g * g_g
        h = o_g * jnp.tanh(c)
    e1 = jax.nn.relu(env_input @ params["w_env1"].T + params["b_env1"])
    e2 = jax.nn.relu(e1 @ params["w_env2"].T + params["b_env2"])
    comb = jnp.concatenate([h, e2], axis=1)
    cf = jax.nn.relu(comb @ params["w_comb"].T + params["b_comb"])
    return cf @ params["w_out"].T + params["b_out"]


# ------------------------------ params init -----------------------------------
def init_params(key):
    ks = jax.random.split(key, 12)
    n = lambda k, s: (0.1 * jax.random.normal(k, s)).astype(jnp.float32)
    return {
        "emb":    n(ks[0], (NUM_MOVES, EMBED_DIM)),
        "w_ih":   n(ks[1], (4 * LSTM_HIDDEN, EMBED_DIM)),
        "w_hh":   n(ks[2], (4 * LSTM_HIDDEN, LSTM_HIDDEN)),
        "b_ih":   n(ks[3], (4 * LSTM_HIDDEN,)),
        "b_hh":   n(ks[4], (4 * LSTM_HIDDEN,)),
        "w_env1": n(ks[5], (ENV_HIDDEN, ENV_IN)),
        "b_env1": n(ks[6], (ENV_HIDDEN,)),
        "w_env2": n(ks[7], (ENV_EMBED_DIM, ENV_HIDDEN)),
        "b_env2": n(ks[8], (ENV_EMBED_DIM,)),
        "w_comb": n(ks[9], (FC_HIDDEN, LSTM_HIDDEN + ENV_EMBED_DIM)),
        "b_comb": n(ks[10], (FC_HIDDEN,)),
        "w_out":  n(ks[11], (NUM_MOVES, FC_HIDDEN)),
        "b_out":  jnp.zeros((NUM_MOVES,), jnp.float32),
    }


if __name__ == "__main__":
    key = jax.random.PRNGKey(0)
    k_env, k_moves, k_params = jax.random.split(key, 3)

    env_input = jax.random.normal(k_env, (BATCH, ENV_IN), jnp.float32)
    moves_seq = jax.random.randint(k_moves, (BATCH, SEQ), 0, NUM_MOVES, jnp.int32)
    params = init_params(k_params)

    out = vip_movement_predictor(env_input, moves_seq, params)
    out = jax.block_until_ready(out)

    ref = vip_reference(env_input, moves_seq, params)
    assert out.shape == (BATCH, NUM_MOVES)
    # bf16 weights on the recurrent path -> slightly looser tolerance than pure f32
    assert jnp.allclose(out, ref, rtol=5e-3, atol=5e-3), (
        f"mismatch: max abs diff {jnp.max(jnp.abs(out - ref))}")

    print("KERNEL_OK")
</pallas_src>

<mosaic_0001>
module attributes {stable_mosaic.version = 11 : i64} {
  func.func @vip_kernel(%arg0: i32, %arg1: memref<64x1xi32, #tpu.memory_space<vmem>>, %arg2: memref<8x9xf32, #tpu.memory_space<vmem>>, %arg3: memref<6x512xbf16, #tpu.memory_space<vmem>>, %arg4: memref<128x512xbf16, #tpu.memory_space<vmem>>, %arg5: memref<9x16xf32, #tpu.memory_space<vmem>>, %arg6: memref<1x16xf32, #tpu.memory_space<vmem>>, %arg7: memref<16x8xf32, #tpu.memory_space<vmem>>, %arg8: memref<1x8xf32, #tpu.memory_space<vmem>>, %arg9: memref<128x32xf32, #tpu.memory_space<vmem>>, %arg10: memref<8x32xf32, #tpu.memory_space<vmem>>, %arg11: memref<1x32xf32, #tpu.memory_space<vmem>>, %arg12: memref<32x128xf32, #tpu.memory_space<vmem>>, %arg13: memref<1x128xf32, #tpu.memory_space<vmem>>, %arg14: memref<8x128xf32, #tpu.memory_space<vmem>>) attributes {dimension_semantics = [#tpu.dimension_semantics<parallel>], iteration_bounds = array<i64: 1>, scalar_prefetch = 0 : i64, scratch_operands = 0 : i64, tpu.core_type = #tpu.core_type<tc>, window_params = [{transform_indices = @transform_0, window_bounds = array<i64: 64, 1>}, {transform_indices = @transform_1, window_bounds = array<i64: 8, 9>}, {pipeline_mode = #tpu.pipeline_mode<synchronous>, transform_indices = @transform_2, window_bounds = array<i64: 6, 512>}, {pipeline_mode = #tpu.pipeline_mode<synchronous>, transform_indices = @transform_3, window_bounds = array<i64: 128, 512>}, {pipeline_mode = #tpu.pipeline_mode<synchronous>, transform_indices = @transform_4, window_bounds = array<i64: 9, 16>}, {pipeline_mode = #tpu.pipeline_mode<synchronous>, transform_indices = @transform_5, window_bounds = array<i64: 1, 16>}, {pipeline_mode = #tpu.pipeline_mode<synchronous>, transform_indices = @transform_6, window_bounds = array<i64: 16, 8>}, {pipeline_mode = #tpu.pipeline_mode<synchronous>, transform_indices = @transform_7, window_bounds = array<i64: 1, 8>}, {pipeline_mode = #tpu.pipeline_mode<synchronous>, transform_indices = @transform_8, window_bounds = array<i64: 128, 32>}, {pipeline_mode = #tpu.pipeline_mode<synchronous>, transform_indices = @transform_9, window_bounds = array<i64: 8, 32>}, {pipeline_mode = #tpu.pipeline_mode<synchronous>, transform_indices = @transform_10, window_bounds = array<i64: 1, 32>}, {pipeline_mode = #tpu.pipeline_mode<synchronous>, transform_indices = @transform_11, window_bounds = array<i64: 32, 128>}, {pipeline_mode = #tpu.pipeline_mode<synchronous>, transform_indices = @transform_12, window_bounds = array<i64: 1, 128>}, {transform_indices = @transform_13, window_bounds = array<i64: 8, 128>}]} {
    %c0 = arith.constant 0 : index
    %c0_0 = arith.constant 0 : index
    %0 = vector.load %arg3[%c0, %c0_0] : memref<6x512xbf16, #tpu.memory_space<vmem>>, vector<6x512xbf16>
    %c0_1 = arith.constant 0 : index
    %c0_2 = arith.constant 0 : index
    %1 = vector.load %arg4[%c0_1, %c0_2] : memref<128x512xbf16, #tpu.memory_space<vmem>>, vector<128x512xbf16>
    %c0_3 = arith.constant 0 : index
    %c0_4 = arith.constant 0 : index
    %2 = vector.load %arg1[%c0_3, %c0_4] : memref<64x1xi32, #tpu.memory_space<vmem>>, vector<64x1xi32>
    %3 = tpu.iota {dimensions = array<i32: 1>} : vector<64x6xi32>
    %4 = vector.broadcast %2 : vector<64x1xi32> to vector<64x6xi32>
    %5 = arith.cmpi eq, %4, %3 : vector<64x6xi32>
    %6 = arith.extui %5 : vector<64x6xi1> to vector<64x6xi32>
    %7 = arith.sitofp %6 : vector<64x6xi32> to vector<64x6xf32>
    %8 = arith.truncf %7 : vector<64x6xf32> to vector<64x6xbf16>
    %cst = arith.constant dense<0.000000e+00> : vector<64x512xf32>
    %9 = tpu.matmul %8, %0, %cst {dimension_numbers = #tpu.dot_dimension_numbers<[1], [0], [0], [1], [0, 0, 1, 1], [], []>} : vector<64x6xbf16>, vector<6x512xbf16>, vector<64x512xf32> -> vector<64x512xf32>
    %cst_5 = arith.constant 0.000000e+00 : f32
    %10 = vector.broadcast %cst_5 : f32 to vector<8x128xf32>
    %cst_6 = arith.constant 0.000000e+00 : f32
    %11 = vector.broadcast %cst_6 : f32 to vector<8x128xf32>
    %12 = vector.extract_strided_slice %9 {offsets = [0, 0], sizes = [8, 512], strides = [1, 1]} : vector<64x512xf32> to vector<8x512xf32>
    %13 = arith.truncf %10 : vector<8x128xf32> to vector<8x128xbf16>
    %cst_7 = arith.constant dense<0.000000e+00> : vector<8x512xf32>
    %14 = tpu.matmul %13, %1, %cst_7 {dimension_numbers = #tpu.dot_dimension_numbers<[1], [0], [0], [1], [0, 0, 1, 1], [], []>} : vector<8x128xbf16>, vector<128x512xbf16>, vector<8x512xf32> -> vector<8x512xf32>
    %15 = arith.addf %12, %14 : vector<8x512xf32>
    %16 = vector.extract_strided_slice %15 {offsets = [0, 0], sizes = [8, 128], strides = [1, 1]} : vector<8x512xf32> to vector<8x128xf32>
    %17 = arith.negf %16 : vector<8x128xf32>
    %18 = math.exp %17 : vector<8x128xf32>
    %cst_8 = arith.constant 1.000000e+00 : f32
    %19 = vector.broadcast %cst_8 : f32 to vector<8x128xf32>
    %20 = arith.addf %19, %18 : vector<8x128xf32>
    %21 = arith.divf %19, %20 : vector<8x128xf32>
    %22 = vector.extract_strided_slice %15 {offsets = [0, 128], sizes = [8, 128], strides = [1, 1]} : vector<8x512xf32> to vector<8x128xf32>
    %23 = arith.negf %22 : vector<8x128xf32>
    %24 = math.exp %23 : vector<8x128xf32>
    %cst_9 = arith.constant 1.000000e+00 : f32
    %25 = vector.broadcast %cst_9 : f32 to vector<8x128xf32>
    %26 = arith.addf %25, %24 : vector<8x128xf32>
    %27 = arith.divf %25, %26 : vector<8x128xf32>
    %28 = vector.extract_strided_slice %15 {offsets = [0, 256], sizes = [8, 128], strides = [1, 1]} : vector<8x512xf32> to vector<8x128xf32>
    %29 = arith.negf %28 : vector<8x128xf32>
    %30 = math.exp %29 : vector<8x128xf32>
    %cst_10 = arith.constant 1.000000e+00 : f32
    %31 = vector.broadcast %cst_10 : f32 to vector<8x128xf32>
    %32 = arith.addf %31, %30 : vector<8x128xf32>
    %33 = arith.divf %31, %32 : vector<8x128xf32>
    %34 = vector.extract_strided_slice %15 {offsets = [0, 384], sizes = [8, 128], strides = [1, 1]} : vector<8x512xf32> to vector<8x128xf32>
    %35 = math.tanh %34 : vector<8x128xf32>
    %36 = arith.mulf %27, %11 : vector<8x128xf32>
    %37 = arith.mulf %21, %35 : vector<8x128xf32>
    %38 = arith.addf %36, %37 : vector<8x128xf32>
    %39 = math.tanh %38 : vector<8x128xf32>
    %40 = arith.mulf %33, %39 : vector<8x128xf32>
    %41 = vector.extract_strided_slice %9 {offsets = [8, 0], sizes = [8, 512], strides = [1, 1]} : vector<64x512xf32> to vector<8x512xf32>
    %42 = arith.truncf %40 : vector<8x128xf32> to vector<8x128xbf16>
    %cst_11 = arith.constant dense<0.000000e+00> : vector<8x512xf32>
    %43 = tpu.matmul %42, %1, %cst_11 {dimension_numbers = #tpu.dot_dimension_numbers<[1], [0], [0], [1], [0, 0, 1, 1], [], []>} : vector<8x128xbf16>, vector<128x512xbf16>, vector<8x512xf32> -> vector<8x512xf32>
    %44 = arith.addf %41, %43 : vector<8x512xf32>
    %45 = vector.extract_strided_slice %44 {offsets = [0, 0], sizes = [8, 128], strides = [1, 1]} : vector<8x512xf32> to vector<8x128xf32>
    %46 = arith.negf %45 : vector<8x128xf32>
    %47 = math.exp %46 : vector<8x128xf32>
    %cst_12 = arith.constant 1.000000e+00 : f32
    %48 = vector.broadcast %cst_12 : f32 to vector<8x128xf32>
    %49 = arith.addf %48, %47 : vector<8x128xf32>
    %50 = arith.divf %48, %49 : vector<8x128xf32>
    %51 = vector.extract_strided_slice %44 {offsets = [0, 128], sizes = [8, 128], strides = [1, 1]} : vector<8x512xf32> to vector<8x128xf32>
    %52 = arith.negf %51 : vector<8x128xf32>
    %53 = math.exp %52 : vector<8x128xf32>
    %cst_13 = arith.constant 1.000000e+00 : f32
    %54 = vector.broadcast %cst_13 : f32 to vector<8x128xf32>
    %55 = arith.addf %54, %53 : vector<8x128xf32>
    %56 = arith.divf %54, %55 : vector<8x128xf32>
    %57 = vector.extract_strided_slice %44 {offsets = [0, 256], sizes = [8, 128], strides = [1, 1]} : vector<8x512xf32> to vector<8x128xf32>
    %58 = arith.negf %57 : vector<8x128xf32>
    %59 = math.exp %58 : vector<8x128xf32>
    %cst_14 = arith.constant 1.000000e+00 : f32
    %60 = vector.broadcast %cst_14 : f32 to vector<8x128xf32>
    %61 = arith.addf %60, %59 : vector<8x128xf32>
    %62 = arith.divf %60, %61 : vector<8x128xf32>
    %63 = vector.extract_strided_slice %44 {offsets = [0, 384], sizes = [8, 128], strides = [1, 1]} : vector<8x512xf32> to vector<8x128xf32>
    %64 = math.tanh %63 : vector<8x128xf32>
    %65 = arith.mulf %56, %38 : vector<8x128xf32>
    %66 = arith.mulf %50, %64 : vector<8x128xf32>
    %67 = arith.addf %65, %66 : vector<8x128xf32>
    %68 = math.tanh %67 : vector<8x128xf32>
    %69 = arith.mulf %62, %68 : vector<8x128xf32>
    %70 = vector.extract_strided_slice %9 {offsets = [16, 0], sizes = [8, 512], strides = [1, 1]} : vector<64x512xf32> to vector<8x512xf32>
    %71 = arith.truncf %69 : vector<8x128xf32> to vector<8x128xbf16>
    %cst_15 = arith.constant dense<0.000000e+00> : vector<8x512xf32>
    %72 = tpu.matmul %71, %1, %cst_15 {dimension_numbers = #tpu.dot_dimension_numbers<[1], [0], [0], [1], [0, 0, 1, 1], [], []>} : vector<8x128xbf16>, vector<128x512xbf16>, vector<8x512xf32> -> vector<8x512xf32>
    %73 = arith.addf %70, %72 : vector<8x512xf32>
    %74 = vector.extract_strided_slice %73 {offsets = [0, 0], sizes = [8, 128], strides = [1, 1]} : vector<8x512xf32> to vector<8x128xf32>
    %75 = arith.negf %74 : vector<8x128xf32>
    %76 = math.exp %75 : vector<8x128xf32>
    %cst_16 = arith.constant 1.000000e+00 : f32
    %77 = vector.broadcast %cst_16 : f32 to vector<8x128xf32>
    %78 = arith.addf %77, %76 : vector<8x128xf32>
    %79 = arith.divf %77, %78 : vector<8x128xf32>
    %80 = vector.extract_strided_slice %73 {offsets = [0, 128], sizes = [8, 128], strides = [1, 1]} : vector<8x512xf32> to vector<8x128xf32>
    %81 = arith.negf %80 : vector<8x128xf32>
    %82 = math.exp %81 : vector<8x128xf32>
    %cst_17 = arith.constant 1.000000e+00 : f32
    %83 = vector.broadcast %cst_17 : f32 to vector<8x128xf32>
    %84 = arith.addf %83, %82 : vector<8x128xf32>
    %85 = arith.divf %83, %84 : vector<8x128xf32>
    %86 = vector.extract_strided_slice %73 {offsets = [0, 256], sizes = [8, 128], strides = [1, 1]} : vector<8x512xf32> to vector<8x128xf32>
    %87 = arith.negf %86 : vector<8x128xf32>
    %88 = math.exp %87 : vector<8x128xf32>
    %cst_18 = arith.constant 1.000000e+00 : f32
    %89 = vector.broadcast %cst_18 : f32 to vector<8x128xf32>
    %90 = arith.addf %89, %88 : vector<8x128xf32>
    %91 = arith.divf %89, %90 : vector<8x128xf32>
    %92 = vector.extract_strided_slice %73 {offsets = [0, 384], sizes = [8, 128], strides = [1, 1]} : vector<8x512xf32> to vector<8x128xf32>
    %93 = math.tanh %92 : vector<8x128xf32>
    %94 = arith.mulf %85, %67 : vector<8x128xf32>
    %95 = arith.mulf %79, %93 : vector<8x128xf32>
    %96 = arith.addf %94, %95 : vector<8x128xf32>
    %97 = math.tanh %96 : vector<8x128xf32>
    %98 = arith.mulf %91, %97 : vector<8x128xf32>
    %99 = vector.extract_strided_slice %9 {offsets = [24, 0], sizes = [8, 512], strides = [1, 1]} : vector<64x512xf32> to vector<8x512xf32>
    %100 = arith.truncf %98 : vector<8x128xf32> to vector<8x128xbf16>
    %cst_19 = arith.constant dense<0.000000e+00> : vector<8x512xf32>
    %101 = tpu.matmul %100, %1, %cst_19 {dimension_numbers = #tpu.dot_dimension_numbers<[1], [0], [0], [1], [0, 0, 1, 1], [], []>} : vector<8x128xbf16>, vector<128x512xbf16>, vector<8x512xf32> -> vector<8x512xf32>
    %102 = arith.addf %99, %101 : vector<8x512xf32>
    %103 = vector.extract_strided_slice %102 {offsets = [0, 0], sizes = [8, 128], strides = [1, 1]} : vector<8x512xf32> to vector<8x128xf32>
    %104 = arith.negf %103 : vector<8x128xf32>
    %105 = math.exp %104 : vector<8x128xf32>
    %cst_20 = arith.constant 1.000000e+00 : f32
    %106 = vector.broadcast %cst_20 : f32 to vector<8x128xf32>
    %107 = arith.addf %106, %105 : vector<8x128xf32>
    %108 = arith.divf %106, %107 : vector<8x128xf32>
    %109 = vector.extract_strided_slice %102 {offsets = [0, 128], sizes = [8, 128], strides = [1, 1]} : vector<8x512xf32> to vector<8x128xf32>
    %110 = arith.negf %109 : vector<8x128xf32>
    %111 = math.exp %110 : vector<8x128xf32>
    %cst_21 = arith.constant 1.000000e+00 : f32
    %112 = vector.broadcast %cst_21 : f32 to vector<8x128xf32>
    %113 = arith.addf %112, %111 : vector<8x128xf32>
    %114 = arith.divf %112, %113 : vector<8x128xf32>
    %115 = vector.extract_strided_slice %102 {offsets = [0, 256], sizes = [8, 128], strides = [1, 1]} : vector<8x512xf32> to vector<8x128xf32>
    %116 = arith.negf %115 : vector<8x128xf32>
    %117 = math.exp %116 : vector<8x128xf32>
    %cst_22 = arith.constant 1.000000e+00 : f32
    %118 = vector.broadcast %cst_22 : f32 to vector<8x128xf32>
    %119 = arith.addf %118, %117 : vector<8x128xf32>
    %120 = arith.divf %118, %119 : vector<8x128xf32>
    %121 = vector.extract_strided_slice %102 {offsets = [0, 384], sizes = [8, 128], strides = [1, 1]} : vector<8x512xf32> to vector<8x128xf32>
    %122 = math.tanh %121 : vector<8x128xf32>
    %123 = arith.mulf %114, %96 : vector<8x128xf32>
    %124 = arith.mulf %108, %122 : vector<8x128xf32>
    %125 = arith.addf %123, %124 : vector<8x128xf32>
    %126 = math.tanh %125 : vector<8x128xf32>
    %127 = arith.mulf %120, %126 : vector<8x128xf32>
    %128 = vector.extract_strided_slice %9 {offsets = [32, 0], sizes = [8, 512], strides = [1, 1]} : vector<64x512xf32> to vector<8x512xf32>
    %129 = arith.truncf %127 : vector<8x128xf32> to vector<8x128xbf16>
    %cst_23 = arith.constant dense<0.000000e+00> : vector<8x512xf32>
    %130 = tpu.matmul %129, %1, %cst_23 {dimension_numbers = #tpu.dot_dimension_numbers<[1], [0], [0], [1], [0, 0, 1, 1], [], []>} : vector<8x128xbf16>, vector<128x512xbf16>, vector<8x512xf32> -> vector<8x512xf32>
    %131 = arith.addf %128, %130 : vector<8x512xf32>
    %132 = vector.extract_strided_slice %131 {offsets = [0, 0], sizes = [8, 128], strides = [1, 1]} : vector<8x512xf32> to vector<8x128xf32>
    %133 = arith.negf %132 : vector<8x128xf32>
    %134 = math.exp %133 : vector<8x128xf32>
    %cst_24 = arith.constant 1.000000e+00 : f32
    %135 = vector.broadcast %cst_24 : f32 to vector<8x128xf32>
    %136 = arith.addf %135, %134 : vector<8x128xf32>
    %137 = arith.divf %135, %136 : vector<8x128xf32>
    %138 = vector.extract_strided_slice %131 {offsets = [0, 128], sizes = [8, 128], strides = [1, 1]} : vector<8x512xf32> to vector<8x128xf32>
    %139 = arith.negf %138 : vector<8x128xf32>
    %140 = math.exp %139 : vector<8x128xf32>
    %cst_25 = arith.constant 1.000000e+00 : f32
    %141 = vector.broadcast %cst_25 : f32 to vector<8x128xf32>
    %142 = arith.addf %141, %140 : vector<8x128xf32>
    %143 = arith.divf %141, %142 : vector<8x128xf32>
    %144 = vector.extract_strided_slice %131 {offsets = [0, 256], sizes = [8, 128], strides = [1, 1]} : vector<8x512xf32> to vector<8x128xf32>
    %145 = arith.negf %144 : vector<8x128xf32>
    %146 = math.exp %145 : vector<8x128xf32>
    %cst_26 = arith.constant 1.000000e+00 : f32
    %147 = vector.broadcast %cst_26 : f32 to vector<8x128xf32>
    %148 = arith.addf %147, %146 : vector<8x128xf32>
    %149 = arith.divf %147, %148 : vector<8x128xf32>
    %150 = vector.extract_strided_slice %131 {offsets = [0, 384], sizes = [8, 128], strides = [1, 1]} : vector<8x512xf32> to vector<8x128xf32>
    %151 = math.tanh %150 : vector<8x128xf32>
    %152 = arith.mulf %143, %125 : vector<8x128xf32>
    %153 = arith.mulf %137, %151 : vector<8x128xf32>
    %154 = arith.addf %152, %153 : vector<8x128xf32>
    %155 = math.tanh %154 : vector<8x128xf32>
    %156 = arith.mulf %149, %155 : vector<8x128xf32>
    %157 = vector.extract_strided_slice %9 {offsets = [40, 0], sizes = [8, 512], strides = [1, 1]} : vector<64x512xf32> to vector<8x512xf32>
    %158 = arith.truncf %156 : vector<8x128xf32> to vector<8x128xbf16>
    %cst_27 = arith.constant dense<0.000000e+00> : vector<8x512xf32>
    %159 = tpu.matmul %158, %1, %cst_27 {dimension_numbers = #tpu.dot_dimension_numbers<[1], [0], [0], [1], [0, 0, 1, 1], [], []>} : vector<8x128xbf16>, vector<128x512xbf16>, vector<8x512xf32> -> vector<8x512xf32>
    %160 = arith.addf %157, %159 : vector<8x512xf32>
    %161 = vector.extract_strided_slice %160 {offsets = [0, 0], sizes = [8, 128], strides = [1, 1]} : vector<8x512xf32> to vector<8x128xf32>
    %162 = arith.negf %161 : vector<8x128xf32>
    %163 = math.exp %162 : vector<8x128xf32>
    %cst_28 = arith.constant 1.000000e+00 : f32
    %164 = vector.broadcast %cst_28 : f32 to vector<8x128xf32>
    %165 = arith.addf %164, %163 : vector<8x128xf32>
    %166 = arith.divf %164, %165 : vector<8x128xf32>
    %167 = vector.extract_strided_slice %160 {offsets = [0, 128], sizes = [8, 128], strides = [1, 1]} : vector<8x512xf32> to vector<8x128xf32>
    %168 = arith.negf %167 : vector<8x128xf32>
    %169 = math.exp %168 : vector<8x128xf32>
    %cst_29 = arith.constant 1.000000e+00 : f32
    %170 = vector.broadcast %cst_29 : f32 to vector<8x128xf32>
    %171 = arith.addf %170, %169 : vector<8x128xf32>
    %172 = arith.divf %170, %171 : vector<8x128xf32>
    %173 = vector.extract_strided_slice %160 {offsets = [0, 256], sizes = [8, 128], strides = [1, 1]} : vector<8x512xf32> to vector<8x128xf32>
    %174 = arith.negf %173 : vector<8x128xf32>
    %175 = math.exp %174 : vector<8x128xf32>
    %cst_30 = arith.constant 1.000000e+00 : f32
    %176 = vector.broadcast %cst_30 : f32 to vector<8x128xf32>
    %177 = arith.addf %176, %175 : vector<8x128xf32>
    %178 = arith.divf %176, %177 : vector<8x128xf32>
    %179 = vector.extract_strided_slice %160 {offsets = [0, 384], sizes = [8, 128], strides = [1, 1]} : vector<8x512xf32> to vector<8x128xf32>
    %180 = math.tanh %179 : vector<8x128xf32>
    %181 = arith.mulf %172, %154 : vector<8x128xf32>
    %182 = arith.mulf %166, %180 : vector<8x128xf32>
    %183 = arith.addf %181, %182 : vector<8x128xf32>
    %184 = math.tanh %183 : vector<8x128xf32>
    %185 = arith.mulf %178, %184 : vector<8x128xf32>
    %186 = vector.extract_strided_slice %9 {offsets = [48, 0], sizes = [8, 512], strides = [1, 1]} : vector<64x512xf32> to vector<8x512xf32>
    %187 = arith.truncf %185 : vector<8x128xf32> to vector<8x128xbf16>
    %cst_31 = arith.constant dense<0.000000e+00> : vector<8x512xf32>
    %188 = tpu.matmul %187, %1, %cst_31 {dimension_numbers = #tpu.dot_dimension_numbers<[1], [0], [0], [1], [0, 0, 1, 1], [], []>} : vector<8x128xbf16>, vector<128x512xbf16>, vector<8x512xf32> -> vector<8x512xf32>
    %189 = arith.addf %186, %188 : vector<8x512xf32>
    %190 = vector.extract_strided_slice %189 {offsets = [0, 0], sizes = [8, 128], strides = [1, 1]} : vector<8x512xf32> to vector<8x128xf32>
    %191 = arith.negf %190 : vector<8x128xf32>
    %192 = math.exp %191 : vector<8x128xf32>
    %cst_32 = arith.constant 1.000000e+00 : f32
    %193 = vector.broadcast %cst_32 : f32 to vector<8x128xf32>
    %194 = arith.addf %193, %192 : vector<8x128xf32>
    %195 = arith.divf %193, %194 : vector<8x128xf32>
    %196 = vector.extract_strided_slice %189 {offsets = [0, 128], sizes = [8, 128], strides = [1, 1]} : vector<8x512xf32> to vector<8x128xf32>
    %197 = arith.negf %196 : vector<8x128xf32>
    %198 = math.exp %197 : vector<8x128xf32>
    %cst_33 = arith.constant 1.000000e+00 : f32
    %199 = vector.broadcast %cst_33 : f32 to vector<8x128xf32>
    %200 = arith.addf %199, %198 : vector<8x128xf32>
    %201 = arith.divf %199, %200 : vector<8x128xf32>
    %202 = vector.extract_strided_slice %189 {offsets = [0, 256], sizes = [8, 128], strides = [1, 1]} : vector<8x512xf32> to vector<8x128xf32>
    %203 = arith.negf %202 : vector<8x128xf32>
    %204 = math.exp %203 : vector<8x128xf32>
    %cst_34 = arith.constant 1.000000e+00 : f32
    %205 = vector.broadcast %cst_34 : f32 to vector<8x128xf32>
    %206 = arith.addf %205, %204 : vector<8x128xf32>
    %207 = arith.divf %205, %206 : vector<8x128xf32>
    %208 = vector.extract_strided_slice %189 {offsets = [0, 384], sizes = [8, 128], strides = [1, 1]} : vector<8x512xf32> to vector<8x128xf32>
    %209 = math.tanh %208 : vector<8x128xf32>
    %210 = arith.mulf %201, %183 : vector<8x128xf32>
    %211 = arith.mulf %195, %209 : vector<8x128xf32>
    %212 = arith.addf %210, %211 : vector<8x128xf32>
    %213 = math.tanh %212 : vector<8x128xf32>
    %214 = arith.mulf %207, %213 : vector<8x128xf32>
    %215 = vector.extract_strided_slice %9 {offsets = [56, 0], sizes = [8, 512], strides = [1, 1]} : vector<64x512xf32> to vector<8x512xf32>
    %216 = arith.truncf %214 : vector<8x128xf32> to vector<8x128xbf16>
    %cst_35 = arith.constant dense<0.000000e+00> : vector<8x512xf32>
    %217 = tpu.matmul %216, %1, %cst_35 {dimension_numbers = #tpu.dot_dimension_numbers<[1], [0], [0], [1], [0, 0, 1, 1], [], []>} : vector<8x128xbf16>, vector<128x512xbf16>, vector<8x512xf32> -> vector<8x512xf32>
    %218 = arith.addf %215, %217 : vector<8x512xf32>
    %219 = vector.extract_strided_slice %218 {offsets = [0, 0], sizes = [8, 128], strides = [1, 1]} : vector<8x512xf32> to vector<8x128xf32>
    %220 = arith.negf %219 : vector<8x128xf32>
    %221 = math.exp %220 : vector<8x128xf32>
    %cst_36 = arith.constant 1.000000e+00 : f32
    %222 = vector.broadcast %cst_36 : f32 to vector<8x128xf32>
    %223 = arith.addf %222, %221 : vector<8x128xf32>
    %224 = arith.divf %222, %223 : vector<8x128xf32>
    %225 = vector.extract_strided_slice %218 {offsets = [0, 128], sizes = [8, 128], strides = [1, 1]} : vector<8x512xf32> to vector<8x128xf32>
    %226 = arith.negf %225 : vector<8x128xf32>
    %227 = math.exp %226 : vector<8x128xf32>
    %cst_37 = arith.constant 1.000000e+00 : f32
    %228 = vector.broadcast %cst_37 : f32 to vector<8x128xf32>
    %229 = arith.addf %228, %227 : vector<8x128xf32>
    %230 = arith.divf %228, %229 : vector<8x128xf32>
    %231 = vector.extract_strided_slice %218 {offsets = [0, 256], sizes = [8, 128], strides = [1, 1]} : vector<8x512xf32> to vector<8x128xf32>
    %232 = arith.negf %231 : vector<8x128xf32>
    %233 = math.exp %232 : vector<8x128xf32>
    %cst_38 = arith.constant 1.000000e+00 : f32
    %234 = vector.broadcast %cst_38 : f32 to vector<8x128xf32>
    %235 = arith.addf %234, %233 : vector<8x128xf32>
    %236 = arith.divf %234, %235 : vector<8x128xf32>
    %237 = vector.extract_strided_slice %218 {offsets = [0, 384], sizes = [8, 128], strides = [1, 1]} : vector<8x512xf32> to vector<8x128xf32>
    %238 = math.tanh %237 : vector<8x128xf32>
    %239 = arith.mulf %230, %212 : vector<8x128xf32>
    %240 = arith.mulf %224, %238 : vector<8x128xf32>
    %241 = arith.addf %239, %240 : vector<8x128xf32>
    %242 = math.tanh %241 : vector<8x128xf32>
    %243 = arith.mulf %236, %242 : vector<8x128xf32>
    %c0_39 = arith.constant 0 : index
    %c0_40 = arith.constant 0 : index
    %244 = vector.load %arg2[%c0_39, %c0_40] : memref<8x9xf32, #tpu.memory_space<vmem>>, vector<8x9xf32>
    %c0_41 = arith.constant 0 : index
    %c0_42 = arith.constant 0 : index
    %245 = vector.load %arg5[%c0_41, %c0_42] : memref<9x16xf32, #tpu.memory_space<vmem>>, vector<9x16xf32>
    %cst_43 = arith.constant dense<0.000000e+00> : vector<8x16xf32>
    %246 = tpu.matmul %244, %245, %cst_43 {dimension_numbers = #tpu.dot_dimension_numbers<[1], [0], [0], [1], [0, 0, 1, 1], [], []>} : vector<8x9xf32>, vector<9x16xf32>, vector<8x16xf32> -> vector<8x16xf32>
    %c0_44 = arith.constant 0 : index
    %c0_45 = arith.constant 0 : index
    %247 = vector.load %arg6[%c0_44, %c0_45] : memref<1x16xf32, #tpu.memory_space<vmem>>, vector<1x16xf32>
    %248 = vector.broadcast %247 : vector<1x16xf32> to vector<8x16xf32>
    %249 = arith.addf %246, %248 : vector<8x16xf32>
    %cst_46 = arith.constant 0.000000e+00 : f32
    %250 = vector.broadcast %cst_46 : f32 to vector<8x16xf32>
    %251 = arith.maximumf %249, %250 : vector<8x16xf32>
    %c0_47 = arith.constant 0 : index
    %c0_48 = arith.constant 0 : index
    %252 = vector.load %arg7[%c0_47, %c0_48] : memref<16x8xf32, #tpu.memory_space<vmem>>, vector<16x8xf32>
    %cst_49 = arith.constant dense<0.000000e+00> : vector<8x8xf32>
    %253 = tpu.matmul %251, %252, %cst_49 {dimension_numbers = #tpu.dot_dimension_numbers<[1], [0], [0], [1], [0, 0, 1, 1], [], []>} : vector<8x16xf32>, vector<16x8xf32>, vector<8x8xf32> -> vector<8x8xf32>
    %c0_50 = arith.constant 0 : index
    %c0_51 = arith.constant 0 : index
    %254 = vector.load %arg8[%c0_50, %c0_51] : memref<1x8xf32, #tpu.memory_space<vmem>>, vector<1x8xf32>
    %255 = vector.broadcast %254 : vector<1x8xf32> to vector<8x8xf32>
    %256 = arith.addf %253, %255 : vector<8x8xf32>
    %cst_52 = arith.constant 0.000000e+00 : f32
    %257 = vector.broadcast %cst_52 : f32 to vector<8x8xf32>
    %258 = arith.maximumf %256, %257 : vector<8x8xf32>
    %c0_53 = arith.constant 0 : index
    %c0_54 = arith.constant 0 : index
    %259 = vector.load %arg9[%c0_53, %c0_54] : memref<128x32xf32, #tpu.memory_space<vmem>>, vector<128x32xf32>
    %cst_55 = arith.constant dense<0.000000e+00> : vector<8x32xf32>
    %260 = tpu.matmul %243, %259, %cst_55 {dimension_numbers = #tpu.dot_dimension_numbers<[1], [0], [0], [1], [0, 0, 1, 1], [], []>} : vector<8x128xf32>, vector<128x32xf32>, vector<8x32xf32> -> vector<8x32xf32>
    %c0_56 = arith.constant 0 : index
    %c0_57 = arith.constant 0 : index
    %261 = vector.load %arg10[%c0_56, %c0_57] : memref<8x32xf32, #tpu.memory_space<vmem>>, vector<8x32xf32>
    %cst_58 = arith.constant dense<0.000000e+00> : vector<8x32xf32>
    %262 = tpu.matmul %258, %261, %cst_58 {dimension_numbers = #tpu.dot_dimension_numbers<[1], [0], [0], [1], [0, 0, 1, 1], [], []>} : vector<8x8xf32>, vector<8x32xf32>, vector<8x32xf32> -> vector<8x32xf32>
    %263 = arith.addf %260, %262 : vector<8x32xf32>
    %c0_59 = arith.constant 0 : index
    %c0_60 = arith.constant 0 : index
    %264 = vector.load %arg11[%c0_59, %c0_60] : memref<1x32xf32, #tpu.memory_space<vmem>>, vector<1x32xf32>
    %265 = vector.broadcast %264 : vector<1x32xf32> to vector<8x32xf32>
    %266 = arith.addf %263, %265 : vector<8x32xf32>
    %cst_61 = arith.constant 0.000000e+00 : f32
    %267 = vector.broadcast %cst_61 : f32 to vector<8x32xf32>
    %268 = arith.maximumf %266, %267 : vector<8x32xf32>
    %c0_62 = arith.constant 0 : index
    %c0_63 = arith.constant 0 : index
    %269 = vector.load %arg12[%c0_62, %c0_63] : memref<32x128xf32, #tpu.memory_space<vmem>>, vector<32x128xf32>
    %cst_64 = arith.constant dense<0.000000e+00> : vector<8x128xf32>
    %270 = tpu.matmul %268, %269, %cst_64 {dimension_numbers = #tpu.dot_dimension_numbers<[1], [0], [0], [1], [0, 0, 1, 1], [], []>} : vector<8x32xf32>, vector<32x128xf32>, vector<8x128xf32> -> vector<8x128xf32>
    %c0_65 = arith.constant 0 : index
    %c0_66 = arith.constant 0 : index
    %271 = vector.load %arg13[%c0_65, %c0_66] : memref<1x128xf32, #tpu.memory_space<vmem>>, vector<1x128xf32>
    %272 = vector.broadcast %271 : vector<1x128xf32> to vector<8x128xf32>
    %273 = arith.addf %270, %272 : vector<8x128xf32>
    %c0_67 = arith.constant 0 : index
    %c0_68 = arith.constant 0 : index
    %274 = vector.load %arg14[%c0_67, %c0_68] : memref<8x128xf32, #tpu.memory_space<vmem>>, vector<8x128xf32>
    tpu.vector_store %arg14[%c0_67, %c0_68], %273 {strides = array<i32>} : memref<8x128xf32, #tpu.memory_space<vmem>>, vector<8x128xf32>,
    return
  }
  func.func @transform_0(%arg0: i32) -> (i32, i32) {
    %c0_i32 = arith.constant 0 : i32
    %c0_i32_0 = arith.constant 0 : i32
    return %arg0, %c0_i32 : i32, i32
  }
  func.func @transform_1(%arg0: i32) -> (i32, i32) {
    %c0_i32 = arith.constant 0 : i32
    %c0_i32_0 = arith.constant 0 : i32
    return %arg0, %c0_i32 : i32, i32
  }
  func.func @transform_2(%arg0: i32) -> (i32, i32) {
    %c0_i32 = arith.constant 0 : i32
    %c0_i32_0 = arith.constant 0 : i32
    %c0_i32_1 = arith.constant 0 : i32
    return %c0_i32, %c0_i32_0 : i32, i32
  }
  func.func @transform_3(%arg0: i32) -> (i32, i32) {
    %c0_i32 = arith.constant 0 : i32
    %c0_i32_0 = arith.constant 0 : i32
    %c0_i32_1 = arith.constant 0 : i32
    return %c0_i32, %c0_i32_0 : i32, i32
  }
  func.func @transform_4(%arg0: i32) -> (i32, i32) {
    %c0_i32 = arith.constant 0 : i32
    %c0_i32_0 = arith.constant 0 : i32
    %c0_i32_1 = arith.constant 0 : i32
    return %c0_i32, %c0_i32_0 : i32, i32
  }
  func.func @transform_5(%arg0: i32) -> (i32, i32) {
    %c0_i32 = arith.constant 0 : i32
    %c0_i32_0 = arith.constant 0 : i32
    %c0_i32_1 = arith.constant 0 : i32
    return %c0_i32, %c0_i32_0 : i32, i32
  }
  func.func @transform_6(%arg0: i32) -> (i32, i32) {
    %c0_i32 = arith.constant 0 : i32
    %c0_i32_0 = arith.constant 0 : i32
    %c0_i32_1 = arith.constant 0 : i32
    return %c0_i32, %c0_i32_0 : i32, i32
  }
  func.func @transform_7(%arg0: i32) -> (i32, i32) {
    %c0_i32 = arith.constant 0 : i32
    %c0_i32_0 = arith.constant 0 : i32
    %c0_i32_1 = arith.constant 0 : i32
    return %c0_i32, %c0_i32_0 : i32, i32
  }
  func.func @transform_8(%arg0: i32) -> (i32, i32) {
    %c0_i32 = arith.constant 0 : i32
    %c0_i32_0 = arith.constant 0 : i32
    %c0_i32_1 = arith.constant 0 : i32
    return %c0_i32, %c0_i32_0 : i32, i32
  }
  func.func @transform_9(%arg0: i32) -> (i32, i32) {
    %c0_i32 = arith.constant 0 : i32
    %c0_i32_0 = arith.constant 0 : i32
    %c0_i32_1 = arith.constant 0 : i32
    return %c0_i32, %c0_i32_0 : i32, i32
  }
  func.func @transform_10(%arg0: i32) -> (i32, i32) {
    %c0_i32 = arith.constant 0 : i32
    %c0_i32_0 = arith.constant 0 : i32
    %c0_i32_1 = arith.constant 0 : i32
    return %c0_i32, %c0_i32_0 : i32, i32
  }
  func.func @transform_11(%arg0: i32) -> (i32, i32) {
    %c0_i32 = arith.constant 0 : i32
    %c0_i32_0 = arith.constant 0 : i32
    %c0_i32_1 = arith.constant 0 : i32
    return %c0_i32, %c0_i32_0 : i32, i32
  }
  func.func @transform_12(%arg0: i32) -> (i32, i32) {
    %c0_i32 = arith.constant 0 : i32
    %c0_i32_0 = arith.constant 0 : i32
    %c0_i32_1 = arith.constant 0 : i32
    return %c0_i32, %c0_i32_0 : i32, i32
  }
  func.func @transform_13(%arg0: i32) -> (i32, i32) {
    %c0_i32 = arith.constant 0 : i32
    %c0_i32_0 = arith.constant 0 : i32
    return %arg0, %c0_i32 : i32, i32
  }
}

</mosaic_0001>

<bundles_post_ra>
// kernel: vip_movement_predictor.1
= control target key start
LH: loop header
LB: loop body
LE: loop exit
PB: predicated region body
PF: predicated region fallthrough
CT: control target
= control target key end

     0   :  { %v3127_v0 = vmov 0   ;;  %vm164_vm0 = vcmask 1042432   ;;  %v87_v19 = vlaneseq  ;;  %vm151_vm3 = vcmask 48128   ;;  %s3111_s0 = inlined_call_operand.vmem [shape: s32[64,1], index: 0, kind: input, shape index: {}]   ;;  %s3112_s2 = inlined_call_operand.vmem [shape: bf16[6,512], index: 2, kind: input, shape index: {}]   ;;  %s3113_s3 = inlined_call_operand.vmem [shape: bf16[128,512], index: 3, kind: input, shape index: {}]   ;;  %s3114_s4 = inlined_call_operand.vmem [shape: f32[9,16], index: 4, kind: input, shape index: {}]   ;;  %s3115_s1 = inlined_call_operand.vmem [shape: f32[8,9], index: 1, kind: input, shape index: {}]   ;;  %s3116_s6 = inlined_call_operand.vmem [shape: f32[16,8], index: 6, kind: input, shape index: {}]   ;;  %s3117_s8 = inlined_call_operand.vmem [shape: f32[128,32], index: 8, kind: input, shape index: {}]   ;;  %s3118_s5 = inlined_call_operand.vmem [shape: f32[1,16], index: 5, kind: input, shape index: {}]   ;;  %s3119_s9 = inlined_call_operand.vmem [shape: f32[8,32], index: 9, kind: input, shape index: {}]   ;;  %s3120_s7 = inlined_call_operand.vmem [shape: f32[1,8], index: 7, kind: input, shape index: {}]   ;;  %s3121_s11 = inlined_call_operand.vmem [shape: f32[32,128], index: 11, kind: input, shape index: {}]   ;;  %s3122_s10 = inlined_call_operand.vmem [shape: f32[1,32], index: 10, kind: input, shape index: {}]   ;;  %s3123_s12 = inlined_call_operand.vmem [shape: f32[1,128], index: 12, kind: input, shape index: {}]   ;;  %s3124_s13 = inlined_call_operand.vmem [shape: f32[8,128], index: 13, kind: output, shape index: {}]  }
   0x1   :  { %2028 = vset.pattern.permute.xlu1 %v3127_v0  ;;  %2027 = vset.pattern.permute.xlu0 %v3127_v0  ;;  %v81_v1 = vld [vmem:[%s3111_s0 + $0x10] sm:$0xff]  ;;  %v79_v2 = vld [vmem:[%s3111_s0] sm:$0xff]  ;;  %v82_v3 = vld [vmem:[%s3111_s0 + $0x18] sm:$0xff]  ;;  %v3125_v24 = vmov 0.0   ;;  %vm1384_vm10 = vcmask 1040384   ;;  %vm2244_vm11 = vmmov 1  }
   0x2   :  { %96 = vperm.xlu1 %2028, %v81_v1   ;;  %90 = vperm.xlu0 %2027, %v79_v2   ;;  %v80_v4 = vld [vmem:[%s3111_s0 + $0x8] sm:$0xff]  ;;  %v45_v5 = vld [vmem:[%s3112_s2] sm:$0x77]  ;;  %v86_v16 = vld [vmem:[%s3111_s0 + $0x38] sm:$0xff]  ;;  %v2362_v20 = vand.u32 127, %v87_v19  ;;  %vm2245_vm13 = vmmov 0  }
   0x3   :  { %209 = vmatprep.mubr.bf16.mxu0 %v3127_v0  ;;  %282 = vmatprep.mubr.bf16.mxu1 %v3127_v0  ;;  %v1812_v6 = vcombine.high %v45_v5, %v45_v5  ;;  %v1811_v7 = vcombine.low %v45_v5, %v45_v5  ;;  %v46_v8 = vld [vmem:[%s3112_s2 + $0x8] sm:$0x77]  ;;  %v83_v13 = vld [vmem:[%s3111_s0 + $0x20] sm:$0xff]  ;;  %v85_v17 = vld [vmem:[%s3111_s0 + $0x30] sm:$0xff]  ;;  %vm1380_vm14 = vcmask 72704   ;;  %vm1468_vm15 = vcmask 130048  }
   0x4   :  { %v1814_v9 = vcombine.high %v46_v8, %v46_v8  ;;  %v1813_v10 = vcombine.low %v46_v8, %v46_v8  ;;  %v84_v12 = vld [vmem:[%s3111_s0 + $0x28] sm:$0xff]  ;;  %v2347_v15 = vld [vmem:[%s3113_s3 + $0x4] ss:$16 sps:$4 sm:$0xff]   ;;  %v2371_v27 = vld [vmem:[%s3113_s3] ss:$16 sps:$4 sm:$0xff]  }
   0x5   :  { %v166_v11 = vsel %vm164_vm0, %v1811_v7, 0  ;;  %1815 = vmatprep.subr.msk.bf16.mxu0 %vm164_vm0, %v1812_v6  ;;  %v2358_v18 = vld [vmem:[%s3113_s3 + $0xc] ss:$16 sps:$4 sm:$0xff]   ;;  %v2376_v28 = vld [vmem:[%s3113_s3 + $0x8] ss:$16 sps:$4 sm:$0xff]   ;;  %vm1987_vm12 = vmpackc.low %vm1384_vm10, %vm2244_vm11 }
   0x6   :  { %99 = vperm.xlu1 %2028, %v82_v3   ;;  %93 = vperm.xlu0 %2027, %v80_v4   ;;  %v172_v14 = vsel %vm164_vm0, %v1813_v10, 0  ;;  %v2381_v30 = vld [vmem:[%s3113_s3 + $0x24] ss:$16 sps:$4 sm:$0xff]   ;;  %v2386_v31 = vld [vmem:[%s3113_s3 + $0x2c] ss:$16 sps:$4 sm:$0xff]  }
   0x7   :  { %1820 = vmatprep.subr.msk.bf16.mxu1 %vm164_vm0, %v1814_v9  ;;  %178 = vmatpush1.bf16.msra.mxu0 %v166_v11  ;;  %v2397_v33 = vld [vmem:[%s3113_s3 + $0x20] ss:$16 sps:$4 sm:$0xff]   ;;  %v2402_v34 = vld [vmem:[%s3113_s3 + $0x28] ss:$16 sps:$4 sm:$0xff]   ;;  %v2409_v35 = vld [vmem:[%s3113_s3 + $0x44] ss:$16 sps:$4 sm:$0xff]  }
   0x8   :  { %251 = vmatpush1.bf16.msra.mxu1 %v172_v14  ;;  %483 = vmatprep.subr.bf16.mxu0 %v2347_v15  ;;  %v2414_v36 = vld [vmem:[%s3113_s3 + $0x4c] ss:$16 sps:$4 sm:$0xff]   ;;  %v2425_v41 = vld [vmem:[%s3113_s3 + $0x40] ss:$16 sps:$4 sm:$0xff]   ;;  %v2430_v42 = vld [vmem:[%s3113_s3 + $0x48] ss:$16 sps:$4 sm:$0xff]  }
   0x9   :  { %524 = vmatprep.subr.bf16.mxu1 %v2358_v18  ;;  %v2437_v44 = vld [vmem:[%s3113_s3 + $0x64] ss:$16 sps:$4 sm:$0xff]   ;;  %v2442_v45 = vld [vmem:[%s3113_s3 + $0x6c] ss:$16 sps:$4 sm:$0xff]   ;;  %v2453_v46 = vld [vmem:[%s3113_s3 + $0x60] ss:$16 sps:$4 sm:$0xff]  }
   0xa   :  { %105 = vperm.xlu1 %2028, %v84_v12   ;;  %102 = vperm.xlu0 %2027, %v83_v13   ;;  %v2458_v47 = vld [vmem:[%s3113_s3 + $0x68] ss:$16 sps:$4 sm:$0xff]   ;;  %v2465_v48 = vld [vmem:[%s3113_s3 + $0x84] ss:$16 sps:$4 sm:$0xff]   ;;  %v2470_v49 = vld [vmem:[%s3113_s3 + $0x8c] ss:$16 sps:$4 sm:$0xff]  }
   0xb   :  { %v2481_v54 = vld [vmem:[%s3113_s3 + $0x80] ss:$16 sps:$4 sm:$0xff]   ;;  %v2486_v55 = vld [vmem:[%s3113_s3 + $0x88] ss:$16 sps:$4 sm:$0xff]   ;;  %v2493_v57 = vld [vmem:[%s3113_s3 + $0xa4] ss:$16 sps:$4 sm:$0xff]  }
   0xc   :  { %v2498_v58 = vld [vmem:[%s3113_s3 + $0xac] ss:$16 sps:$4 sm:$0xff]   ;;  %v2509_v59 = vld [vmem:[%s3113_s3 + $0xa0] ss:$16 sps:$4 sm:$0xff]   ;;  %v2514_v60 = vld [vmem:[%s3113_s3 + $0xa8] ss:$16 sps:$4 sm:$0xff]  }
   0xd   :  { %v2521_v61 = vld [vmem:[%s3113_s3 + $0xc4] ss:$16 sps:$4 sm:$0xff]   ;;  %v2526_v62 = vld [vmem:[%s3113_s3 + $0xcc] ss:$16 sps:$4 sm:$0xff]   ;;  %v2537_v2 = vld [vmem:[%s3113_s3 + $0xc0] ss:$16 sps:$4 sm:$0xff]  }
   0xe   :  { %111 = vperm.xlu1 %2028, %v86_v16   ;;  %108 = vperm.xlu0 %2027, %v85_v17   ;;  %v2542_v3 = vld [vmem:[%s3113_s3 + $0xc8] ss:$16 sps:$4 sm:$0xff]   ;;  %v2549_v5 = vld [vmem:[%s3113_s3 + $0xe4] ss:$16 sps:$4 sm:$0xff]   ;;  %v2554_v6 = vld [vmem:[%s3113_s3 + $0xec] ss:$16 sps:$4 sm:$0xff]  }
   0xf   :  { %v2563_v7 = vld [vmem:[%s3113_s3 + $0xe0] ss:$16 sps:$4 sm:$0xff]   ;;  %v2568_v8 = vld [vmem:[%s3113_s3 + $0xe8] ss:$16 sps:$4 sm:$0xff]   ;;  %vm1560_vm0 = vcmask 64512  }
  0x81   :  { %v91_v21 = vpop.permute.xlu0 %90  ;;  %v97_v22 = vpop.permute.xlu1 %96 }
  0x82   :  { %vm113_vm1 = vcmp.eq.s32.totalorder %v91_v21, %v2362_v20  ;;  %vm115_vm4 = vcmp.eq.s32.totalorder %v97_v22, %v2362_v20 }
  0x83   :  { %v1803_v25 = vsel %vm113_vm1, 1.0, %v3125_v24  ;;  %v1805_v37 = vsel %vm115_vm4, 1.0, %v3125_v24  ;;  %vm1724_vm1 = vcmask 261120  }
  0x85   :  { %v94_v23 = vpop.permute.xlu0 %93  ;;  %v100_v32 = vpop.permute.xlu1 %99 }
  0x86   :  { %vm114_vm2 = vcmp.eq.s32.totalorder %v94_v23, %v2362_v20  ;;  %vm116_vm5 = vcmp.eq.s32.totalorder %v100_v32, %v2362_v20 }
  0x87   :  { %v1804_v26 = vsel %vm114_vm2, 1.0, %v3125_v24  ;;  %v1806_v38 = vsel %vm116_vm5, 1.0, %v3125_v24 }
  0x88   :  { %v137_v29 = vpack.c.bf16 %v1804_v26, %v1803_v25  ;;  %v138_v43 = vpack.c.bf16 %v1806_v38, %v1805_v37 }
  0x89   :  { %v106_v39 = vpop.permute.xlu1 %105  ;;  %v103_v40 = vpop.permute.xlu0 %102 }
  0x8a   :  { %1816 = vmatmul.mubr.msk.bf16.vlgmr.msra.gmra.mrb[0].mxu0 %vm151_vm3, %v137_v29  ;;  %1821 = vmatmul.mubr.msk.bf16.vlgmr.msra.gmra.mrb[0].mxu1 %vm151_vm3, %v137_v29  ;;  %vm118_vm6 = vcmp.eq.s32.totalorder %v106_v39, %v2362_v20  ;;  %vm117_vm7 = vcmp.eq.s32.totalorder %v103_v40, %v2362_v20 }
  0x8b   :  { %484 = vmatpush1.bf16.msra.mxu0 %v2371_v27  ;;  %525 = vmatpush1.bf16.msra.mxu1 %v2376_v28  ;;  %v1808_v50 = vsel %vm118_vm6, 1.0, %v3125_v24  ;;  %v1807_v51 = vsel %vm117_vm7, 1.0, %v3125_v24 }
  0x8c   :  { %485 = vmatprep.subr.bf16.mxu0 %v2381_v30  ;;  %526 = vmatprep.subr.bf16.mxu1 %v2386_v31  ;;  %v139_v56 = vpack.c.bf16 %v1808_v50, %v1807_v51 }
  0x8d   :  { %219 = vmatprep.mubr.bf16.mxu0 %v3127_v0  ;;  %292 = vmatprep.mubr.bf16.mxu1 %v3127_v0  ;;  %v112_v52 = vpop.permute.xlu1 %111  ;;  %v109_v53 = vpop.permute.xlu0 %108 }
  0x8e   :  { %vm120_vm8 = vcmp.eq.s32.totalorder %v112_v52, %v2362_v20  ;;  %vm119_vm9 = vcmp.eq.s32.totalorder %v109_v53, %v2362_v20 }
  0x8f   :  { %486 = vmatpush1.bf16.msra.mxu0 %v2397_v33  ;;  %527 = vmatpush1.bf16.msra.mxu1 %v2402_v34  ;;  %v1810_v63 = vsel %vm120_vm8, 1.0, %v3125_v24  ;;  %v1809_v1 = vsel %vm119_vm9, 1.0, %v3125_v24 }
  0x90   :  { %487 = vmatprep.subr.bf16.mxu0 %v2409_v35  ;;  %528 = vmatprep.subr.bf16.mxu1 %v2414_v36  ;;  %v140_v4 = vpack.c.bf16 %v1810_v63, %v1809_v1 }
  0x92   :  { %1817 = vmatmul.mubr.msk.bf16.gmra.mrb[4].mxu0 %vm151_vm3, %v138_v43  ;;  %1822 = vmatmul.mubr.msk.bf16.gmra.mrb[4].mxu1 %vm151_vm3, %v138_v43 }
  0x93   :  { %488 = vmatpush1.bf16.msra.mxu0 %v2425_v41  ;;  %529 = vmatpush1.bf16.msra.mxu1 %v2430_v42 }
  0x94   :  { %489 = vmatprep.subr.bf16.mxu0 %v2437_v44  ;;  %530 = vmatprep.subr.bf16.mxu1 %v2442_v45 }
  0x95   :  { %229 = vmatprep.mubr.bf16.mxu0 %v3127_v0  ;;  %302 = vmatprep.mubr.bf16.mxu1 %v3127_v0 }
  0x97   :  { %490 = vmatpush1.bf16.msra.mxu0 %v2453_v46  ;;  %531 = vmatpush1.bf16.msra.mxu1 %v2458_v47 }
  0x98   :  { %491 = vmatprep.subr.bf16.mxu0 %v2465_v48  ;;  %532 = vmatprep.subr.bf16.mxu1 %v2470_v49 }
  0x9a   :  { %1818 = vmatmul.mubr.msk.bf16.gmra.mrb[8].mxu0 %vm151_vm3, %v139_v56  ;;  %1823 = vmatmul.mubr.msk.bf16.gmra.mrb[8].mxu1 %vm151_vm3, %v139_v56 }
  0x9b   :  { %492 = vmatpush1.bf16.msra.mxu0 %v2481_v54  ;;  %533 = vmatpush1.bf16.msra.mxu1 %v2486_v55 }
  0x9c   :  { %493 = vmatprep.subr.bf16.mxu0 %v2493_v57  ;;  %534 = vmatprep.subr.bf16.mxu1 %v2498_v58 }
  0x9d   :  { %239 = vmatprep.mubr.bf16.mxu0 %v3127_v0  ;;  %312 = vmatprep.mubr.bf16.mxu1 %v3127_v0 }
  0x9f   :  { %494 = vmatpush1.bf16.msra.mxu0 %v2509_v59  ;;  %535 = vmatpush1.bf16.msra.mxu1 %v2514_v60 }
  0xa0   :  { %495 = vmatprep.subr.bf16.mxu0 %v2521_v61  ;;  %536 = vmatprep.subr.bf16.mxu1 %v2526_v62 }
  0xa2   :  { %1819 = vmatmul.mubr.msk.bf16.gmra.mrb[12].mxu0 %vm151_vm3, %v140_v4  ;;  %1824 = vmatmul.mubr.msk.bf16.gmra.mrb[12].mxu1 %vm151_vm3, %v140_v4 }
  0xa3   :  { %496 = vmatpush1.bf16.msra.mxu0 %v2537_v2  ;;  %537 = vmatpush1.bf16.msra.mxu1 %v2542_v3 }
  0xa4   :  { %497 = vmatprep.subr.bf16.mxu0 %v2549_v5  ;;  %538 = vmatprep.subr.bf16.mxu1 %v2554_v6 }
  0xa5   :  { %515 = vmatprep.mubr.bf16.mxu0 %v3127_v0  ;;  %556 = vmatprep.mubr.bf16.mxu1 %v3127_v0 }
  0xa7   :  { %498 = vmatpush1.bf16.msra.mxu0 %v2563_v7  ;;  %539 = vmatpush1.bf16.msra.mxu1 %v2568_v8 }
  0xa8   :  { %594 = vmatprep.subr.bf16.mxu0 %v2347_v15  ;;  %635 = vmatprep.subr.bf16.mxu1 %v2358_v18 }
  0xaa   :  { %516 = vmatmul.mubr.bf16.vlgmr.msra.gmra.mrb[16].mxu0 %v3127_v0  ;;  %557 = vmatmul.mubr.bf16.vlgmr.msra.gmra.mrb[16].mxu1 %v3127_v0 }
  0xab   :  { %595 = vmatpush1.bf16.msra.mxu0 %v2371_v27  ;;  %636 = vmatpush1.bf16.msra.mxu1 %v2376_v28 }
  0xac   :  { %596 = vmatprep.subr.bf16.mxu0 %v2381_v30  ;;  %637 = vmatprep.subr.bf16.mxu1 %v2386_v31 }
  0xad   :  { %626 = vmatprep.mubr.bf16.mxu0 %v3127_v0  ;;  %667 = vmatprep.mubr.bf16.mxu1 %v3127_v0 }
  0xaf   :  { %597 = vmatpush1.bf16.msra.mxu0 %v2397_v33  ;;  %638 = vmatpush1.bf16.msra.mxu1 %v2402_v34 }
  0xb0   :  { %598 = vmatprep.subr.bf16.mxu0 %v2409_v35  ;;  %639 = vmatprep.subr.bf16.mxu1 %v2414_v36 }
  0xb3   :  { %599 = vmatpush1.bf16.msra.mxu0 %v2425_v41  ;;  %640 = vmatpush1.bf16.msra.mxu1 %v2430_v42 }
  0xb4   :  { %600 = vmatprep.subr.bf16.mxu0 %v2437_v44  ;;  %641 = vmatprep.subr.bf16.mxu1 %v2442_v45 }
  0xb7   :  { %601 = vmatpush1.bf16.msra.mxu0 %v2453_v46  ;;  %642 = vmatpush1.bf16.msra.mxu1 %v2458_v47 }
  0xb8   :  { %602 = vmatprep.subr.bf16.mxu0 %v2465_v48  ;;  %643 = vmatprep.subr.bf16.mxu1 %v2470_v49 }
  0xbb   :  { %603 = vmatpush1.bf16.msra.mxu0 %v2481_v54  ;;  %644 = vmatpush1.bf16.msra.mxu1 %v2486_v55 }
  0xbc   :  { %604 = vmatprep.subr.bf16.mxu0 %v2493_v57  ;;  %645 = vmatprep.subr.bf16.mxu1 %v2498_v58 }
  0xbf   :  { %605 = vmatpush1.bf16.msra.mxu0 %v2509_v59  ;;  %646 = vmatpush1.bf16.msra.mxu1 %v2514_v60 }
  0xc0   :  { %606 = vmatprep.subr.bf16.mxu0 %v2521_v61  ;;  %647 = vmatprep.subr.bf16.mxu1 %v2526_v62 }
  0xc3   :  { %607 = vmatpush1.bf16.msra.mxu0 %v2537_v2  ;;  %648 = vmatpush1.bf16.msra.mxu1 %v2542_v3 }
  0xc4   :  { %608 = vmatprep.subr.bf16.mxu0 %v2549_v5  ;;  %649 = vmatprep.subr.bf16.mxu1 %v2554_v6 }
  0xc7   :  { %609 = vmatpush1.bf16.msra.mxu0 %v2563_v7  ;;  %650 = vmatpush1.bf16.msra.mxu1 %v2568_v8 }
  0xc8   :  { %705 = vmatprep.subr.bf16.mxu0 %v2347_v15  ;;  %746 = vmatprep.subr.bf16.mxu1 %v2358_v18 }
 0x15d   :  { %v211_v9 = vpop.f32.mrb[0].mxu0  ;;  %v284_v10 = vpop.f32.mrb[0].mxu1 }
 0x15e   :  { %v213_v11 = vpop.f32.mrb[1].mxu0  ;;  %v286_v12 = vpop.f32.mrb[1].mxu1 }
 0x15f   :  { %v2614_v13 = vpop.f32.mrb[2].mxu0  ;;  %v2616_v14 = vpop.f32.mrb[2].mxu1 }
 0x160   :  { %v2618_v16 = vpop.f32.mrb[3].mxu0  ;;  %v2620_v17 = vpop.f32.mrb[3].mxu1 }
 0x165   :  { %v2622_v19 = vpop.f32.mrb[4].mxu0  ;;  %v2624_v20 = vpop.f32.mrb[4].mxu1 }
 0x166   :  { %v2626_v21 = vpop.f32.mrb[5].mxu0  ;;  %v2628_v22 = vpop.f32.mrb[5].mxu1 }
 0x167   :  { %v2630_v23 = vpop.f32.mrb[6].mxu0  ;;  %v2632_v25 = vpop.f32.mrb[6].mxu1 }
 0x168   :  { %v2634_v26 = vpop.f32.mrb[7].mxu0  ;;  %v2636_v29 = vpop.f32.mrb[7].mxu1 }
 0x169   :  { %3129 = vst [vmem:[#allocation2_spill] sm:$0xff] %v2634_v26  ;;  %3130 = vst [vmem:[#allocation3_spill] sm:$0xff] %v2636_v29 }
 0x16d   :  { %v2638_v32 = vpop.f32.mrb[8].mxu0  ;;  %v2640_v37 = vpop.f32.mrb[8].mxu1 }
 0x16e   :  { %3131 = vst [vmem:[#allocation4_spill] sm:$0xff] %v2638_v32  ;;  %3132 = vst [vmem:[#allocation5_spill] sm:$0xff] %v2640_v37  ;;  %v2642_v38 = vpop.f32.mrb[9].mxu0  ;;  %v2644_v39 = vpop.f32.mrb[9].mxu1 }
 0x16f   :  { %3133 = vst [vmem:[#allocation6_spill] sm:$0xff] %v2642_v38  ;;  %3134 = vst [vmem:[#allocation7_spill] sm:$0xff] %v2644_v39  ;;  %v2646_v40 = vpop.f32.mrb[10].mxu0  ;;  %v2648_v43 = vpop.f32.mrb[10].mxu1 }
 0x170   :  { %3135 = vst [vmem:[#allocation8_spill] sm:$0xff] %v2646_v40  ;;  %3136 = vst [vmem:[#allocation9_spill] sm:$0xff] %v2648_v43  ;;  %v2650_v50 = vpop.f32.mrb[11].mxu0  ;;  %v2652_v51 = vpop.f32.mrb[11].mxu1 }
 0x171   :  { %3137 = vst [vmem:[#allocation10_spill] sm:$0xff] %v2650_v50  ;;  %3138 = vst [vmem:[#allocation11_spill] sm:$0xff] %v2652_v51 }
 0x175   :  { %v2654_v52 = vpop.f32.mrb[12].mxu0  ;;  %v2656_v53 = vpop.f32.mrb[12].mxu1 }
 0x176   :  { %3139 = vst [vmem:[#allocation12_spill] sm:$0xff] %v2654_v52  ;;  %3140 = vst [vmem:[#allocation13_spill] sm:$0xff] %v2656_v53  ;;  %v2658_v56 = vpop.f32.mrb[13].mxu0  ;;  %v2660_v63 = vpop.f32.mrb[13].mxu1 }
 0x177   :  { %3141 = vst [vmem:[#allocation14_spill] sm:$0xff] %v2658_v56  ;;  %3142 = vst [vmem:[#allocation15_spill] sm:$0xff] %v2660_v63  ;;  %v2662_v1 = vpop.f32.mrb[14].mxu0  ;;  %v2664_v4 = vpop.f32.mrb[14].mxu1 }
 0x178   :  { %3143 = vst [vmem:[#allocation16_spill] sm:$0xff] %v2662_v1  ;;  %3144 = vst [vmem:[#allocation17_spill] sm:$0xff] %v2664_v4  ;;  %v2666_v24 = vpop.f32.mrb[15].mxu0  ;;  %v2668_v0 = vpop.f32.mrb[15].mxu1 }
 0x179   :  { %3145 = vst [vmem:[#allocation18_spill] sm:$0xff] %v2666_v24  ;;  %3146 = vst [vmem:[#allocation19_spill] sm:$0xff] %v2668_v0 }
 0x17d   :  { %v517_v43 = vpop.f32.mrb[16].mxu0  ;;  %v558_v50 = vpop.f32.mrb[16].mxu1 }
 0x17e   :  { %v565_v40 = vadd.f32 %v517_v43, %v211_v9  ;;  %v567_v51 = vadd.f32 %v558_v50, %v284_v10  ;;  %v519_v39 = vpop.f32.mrb[17].mxu0  ;;  %v560_v52 = vpop.f32.mrb[17].mxu1 }
 0x17f   :  { %v566_v38 = vadd.f32 %v519_v39, %v213_v11  ;;  %v568_v53 = vadd.f32 %v560_v52, %v286_v12  ;;  %v521_v37 = vpop.f32.mrb[18].mxu0  ;;  %v562_v56 = vpop.f32.mrb[18].mxu1 }
 0x180   :  { %v1857_v32 = vmul.f32 -1.442695, %v565_v40  ;;  %v522_v63 = vpop.f32.mrb[19].mxu0  ;;  %v563_v29 = vpop.f32.mrb[19].mxu1  ;;  %v1859_v4 = vmul.f32 -1.442695, %v567_v51 }
 0x181   :  { %v1858_v1 = vmul.f32 -1.442695, %v566_v38 }
 0x182   :  { %2081 = vpow2.f32 %v1857_v32 }
 0x183   :  { %2083 = vpow2.f32 %v1858_v1 }
 0x184   :  { %2085 = vtanh.f32 %v568_v53 }
 0x185   :  { %2087 = vpow2.f32 %v1859_v4 }
 0x18c   :  { %v2082_v24 = vpop.eup %2081 }
 0x18d   :  { %v572_v26 = vadd.f32 1.0, %v2082_v24  ;;  %v2084_v0 = vpop.eup %2083 }
 0x18e   :  { %v578_v9 = vadd.f32 1.0, %v2084_v0  ;;  %v2086_v10 = vpop.eup %2085  ;;  %v3147_v0 = vmov 0  }
 0x18f   :  { %2089 = vrcp.f32 %v572_v26  ;;  %v2088_v11 = vpop.eup %2087 }
 0x190   :  { %2091 = vrcp.f32 %v578_v9  ;;  %v584_v40 = vadd.f32 1.0, %v2088_v11 }
 0x192   :  { %2093 = vrcp.f32 %v584_v40 }
 0x199   :  { %v2090_v12 = vpop.eup %2089 }
 0x19a   :  { %v589_v37 = vmul.f32 %v2090_v12, %v2086_v10  ;;  %v2092_v39 = vpop.eup %2091 }
 0x19b   :  { %v588_v43 = vmul.f32 0.0, %v2092_v39 }
 0x19c   :  { %v2094_v32 = vpop.eup %2093 }
 0x19d   :  { %v2670_v29 = vadd.f32 %v589_v37, %v588_v43 }
 0x19f   :  { %2095 = vtanh.f32 %v2670_v29 }
 0x1a9   :  { %v2096_v24 = vpop.eup %2095 }
 0x1aa   :  { %v592_v38 = vmul.f32 %v2096_v24, %v2094_v32 }
 0x1ac   :  { %v593_v50 = vpack.c.bf16 %v592_v38, %v592_v38 }
 0x1ae   :  { %627 = vmatmul.mubr.bf16.vlgmr.msra.gmra.mrb[20].mxu0 %v593_v50  ;;  %668 = vmatmul.mubr.bf16.vlgmr.msra.gmra.mrb[20].mxu1 %v593_v50 }
 0x1af   :  { %706 = vmatpush1.bf16.msra.mxu0 %v2371_v27  ;;  %747 = vmatpush1.bf16.msra.mxu1 %v2376_v28 }
 0x1b0   :  { %707 = vmatprep.subr.bf16.mxu0 %v2381_v30  ;;  %748 = vmatprep.subr.bf16.mxu1 %v2386_v31 }
 0x1b1   :  { %737 = vmatprep.mubr.bf16.mxu0 %v3147_v0  ;;  %778 = vmatprep.mubr.bf16.mxu1 %v3147_v0 }
 0x1b3   :  { %708 = vmatpush1.bf16.msra.mxu0 %v2397_v33  ;;  %749 = vmatpush1.bf16.msra.mxu1 %v2402_v34 }
 0x1b4   :  { %709 = vmatprep.subr.bf16.mxu0 %v2409_v35  ;;  %750 = vmatprep.subr.bf16.mxu1 %v2414_v36 }
 0x1b7   :  { %710 = vmatpush1.bf16.msra.mxu0 %v2425_v41  ;;  %751 = vmatpush1.bf16.msra.mxu1 %v2430_v42 }
 0x1b8   :  { %711 = vmatprep.subr.bf16.mxu0 %v2437_v44  ;;  %752 = vmatprep.subr.bf16.mxu1 %v2442_v45 }
 0x1bb   :  { %712 = vmatpush1.bf16.msra.mxu0 %v2453_v46  ;;  %753 = vmatpush1.bf16.msra.mxu1 %v2458_v47 }
 0x1bc   :  { %713 = vmatprep.subr.bf16.mxu0 %v2465_v48  ;;  %754 = vmatprep.subr.bf16.mxu1 %v2470_v49 }
 0x1bf   :  { %714 = vmatpush1.bf16.msra.mxu0 %v2481_v54  ;;  %755 = vmatpush1.bf16.msra.mxu1 %v2486_v55 }
 0x1c0   :  { %715 = vmatprep.subr.bf16.mxu0 %v2493_v57  ;;  %756 = vmatprep.subr.bf16.mxu1 %v2498_v58 }
 0x1c3   :  { %716 = vmatpush1.bf16.msra.mxu0 %v2509_v59  ;;  %757 = vmatpush1.bf16.msra.mxu1 %v2514_v60 }
 0x1c4   :  { %717 = vmatprep.subr.bf16.mxu0 %v2521_v61  ;;  %758 = vmatprep.subr.bf16.mxu1 %v2526_v62 }
 0x1c7   :  { %718 = vmatpush1.bf16.msra.mxu0 %v2537_v2  ;;  %759 = vmatpush1.bf16.msra.mxu1 %v2542_v3 }
 0x1c8   :  { %719 = vmatprep.subr.bf16.mxu0 %v2549_v5  ;;  %760 = vmatprep.subr.bf16.mxu1 %v2554_v6 }
 0x1cb   :  { %720 = vmatpush1.bf16.msra.mxu0 %v2563_v7  ;;  %761 = vmatpush1.bf16.msra.mxu1 %v2568_v8 }
 0x1cc   :  { %816 = vmatprep.subr.bf16.mxu0 %v2347_v15  ;;  %857 = vmatprep.subr.bf16.mxu1 %v2358_v18 }
 0x281   :  { %v628_v26 = vpop.f32.mrb[20].mxu0  ;;  %v669_v51 = vpop.f32.mrb[20].mxu1 }
 0x282   :  { %v676_v52 = vadd.f32 %v628_v26, %v2614_v13  ;;  %v678_v53 = vadd.f32 %v669_v51, %v2616_v14  ;;  %v630_v56 = vpop.f32.mrb[21].mxu0  ;;  %v671_v63 = vpop.f32.mrb[21].mxu1 }
 0x283   :  { %v677_v1 = vadd.f32 %v630_v56, %v2618_v16  ;;  %v679_v4 = vadd.f32 %v671_v63, %v2620_v17  ;;  %v632_v9 = vpop.f32.mrb[22].mxu0  ;;  %v673_v10 = vpop.f32.mrb[22].mxu1 }
 0x284   :  { %v1860_v11 = vmul.f32 -1.442695, %v676_v52  ;;  %v633_v12 = vpop.f32.mrb[23].mxu0  ;;  %v674_v37 = vpop.f32.mrb[23].mxu1  ;;  %v1862_v40 = vmul.f32 -1.442695, %v678_v53 }
 0x285   :  { %v1861_v39 = vmul.f32 -1.442695, %v677_v1 }
 0x286   :  { %2097 = vpow2.f32 %v1860_v11 }
 0x287   :  { %2099 = vpow2.f32 %v1861_v39 }
 0x288   :  { %2101 = vtanh.f32 %v679_v4 }
 0x289   :  { %2103 = vpow2.f32 %v1862_v40 }
 0x290   :  { %v2098_v43 = vpop.eup %2097 }
 0x291   :  { %v683_v32 = vadd.f32 1.0, %v2098_v43  ;;  %v2100_v13 = vpop.eup %2099 }
 0x292   :  { %v689_v14 = vadd.f32 1.0, %v2100_v13  ;;  %v2102_v16 = vpop.eup %2101 }
 0x293   :  { %2105 = vrcp.f32 %v683_v32  ;;  %v2104_v24 = vpop.eup %2103 }
 0x294   :  { %2107 = vrcp.f32 %v689_v14  ;;  %v695_v26 = vadd.f32 1.0, %v2104_v24 }
 0x296   :  { %2109 = vrcp.f32 %v695_v26 }
 0x29d   :  { %v2106_v17 = vpop.eup %2105 }
 0x29e   :  { %v700_v38 = vmul.f32 %v2106_v17, %v2102_v16  ;;  %v2108_v50 = vpop.eup %2107 }
 0x29f   :  { %v699_v51 = vmul.f32 %v2108_v50, %v2670_v29 }
 0x2a0   :  { %v2110_v53 = vpop.eup %2109 }
 0x2a1   :  { %v2712_v52 = vadd.f32 %v700_v38, %v699_v51 }
 0x2a3   :  { %2111 = vtanh.f32 %v2712_v52 }
 0x2ad   :  { %v2112_v56 = vpop.eup %2111 }
 0x2ae   :  { %v703_v63 = vmul.f32 %v2112_v56, %v2110_v53 }
 0x2b0   :  { %v704_v1 = vpack.c.bf16 %v703_v63, %v703_v63 }
 0x2b2   :  { %738 = vmatmul.mubr.bf16.vlgmr.msra.gmra.mrb[24].mxu0 %v704_v1  ;;  %779 = vmatmul.mubr.bf16.vlgmr.msra.gmra.mrb[24].mxu1 %v704_v1 }
 0x2b3   :  { %817 = vmatpush1.bf16.msra.mxu0 %v2371_v27  ;;  %858 = vmatpush1.bf16.msra.mxu1 %v2376_v28 }
 0x2b4   :  { %818 = vmatprep.subr.bf16.mxu0 %v2381_v30  ;;  %859 = vmatprep.subr.bf16.mxu1 %v2386_v31 }
 0x2b5   :  { %848 = vmatprep.mubr.bf16.mxu0 %v3147_v0  ;;  %889 = vmatprep.mubr.bf16.mxu1 %v3147_v0 }
 0x2b7   :  { %819 = vmatpush1.bf16.msra.mxu0 %v2397_v33  ;;  %860 = vmatpush1.bf16.msra.mxu1 %v2402_v34 }
 0x2b8   :  { %820 = vmatprep.subr.bf16.mxu0 %v2409_v35  ;;  %861 = vmatprep.subr.bf16.mxu1 %v2414_v36 }
 0x2bb   :  { %821 = vmatpush1.bf16.msra.mxu0 %v2425_v41  ;;  %862 = vmatpush1.bf16.msra.mxu1 %v2430_v42 }
 0x2bc   :  { %822 = vmatprep.subr.bf16.mxu0 %v2437_v44  ;;  %863 = vmatprep.subr.bf16.mxu1 %v2442_v45 }
 0x2bf   :  { %823 = vmatpush1.bf16.msra.mxu0 %v2453_v46  ;;  %864 = vmatpush1.bf16.msra.mxu1 %v2458_v47 }
 0x2c0   :  { %824 = vmatprep.subr.bf16.mxu0 %v2465_v48  ;;  %865 = vmatprep.subr.bf16.mxu1 %v2470_v49 }
 0x2c3   :  { %825 = vmatpush1.bf16.msra.mxu0 %v2481_v54  ;;  %866 = vmatpush1.bf16.msra.mxu1 %v2486_v55 }
 0x2c4   :  { %826 = vmatprep.subr.bf16.mxu0 %v2493_v57  ;;  %867 = vmatprep.subr.bf16.mxu1 %v2498_v58 }
 0x2c7   :  { %827 = vmatpush1.bf16.msra.mxu0 %v2509_v59  ;;  %868 = vmatpush1.bf16.msra.mxu1 %v2514_v60 }
 0x2c8   :  { %828 = vmatprep.subr.bf16.mxu0 %v2521_v61  ;;  %869 = vmatprep.subr.bf16.mxu1 %v2526_v62 }
 0x2cb   :  { %829 = vmatpush1.bf16.msra.mxu0 %v2537_v2  ;;  %870 = vmatpush1.bf16.msra.mxu1 %v2542_v3 }
 0x2cc   :  { %830 = vmatprep.subr.bf16.mxu0 %v2549_v5  ;;  %871 = vmatprep.subr.bf16.mxu1 %v2554_v6 }
 0x2cf   :  { %831 = vmatpush1.bf16.msra.mxu0 %v2563_v7  ;;  %872 = vmatpush1.bf16.msra.mxu1 %v2568_v8 }
 0x2d0   :  { %927 = vmatprep.subr.bf16.mxu0 %v2347_v15  ;;  %968 = vmatprep.subr.bf16.mxu1 %v2358_v18 }
 0x385   :  { %v739_v29 = vpop.f32.mrb[24].mxu0  ;;  %v780_v4 = vpop.f32.mrb[24].mxu1 }
 0x386   :  { %v787_v9 = vadd.f32 %v739_v29, %v2622_v19  ;;  %v789_v10 = vadd.f32 %v780_v4, %v2624_v20  ;;  %v741_v11 = vpop.f32.mrb[25].mxu0  ;;  %v782_v12 = vpop.f32.mrb[25].mxu1 }
 0x387   :  { %v788_v37 = vadd.f32 %v741_v11, %v2626_v21  ;;  %v790_v39 = vadd.f32 %v782_v12, %v2628_v22  ;;  %v743_v40 = vpop.f32.mrb[26].mxu0  ;;  %v784_v43 = vpop.f32.mrb[26].mxu1 }
 0x388   :  { %v1863_v32 = vmul.f32 -1.442695, %v787_v9  ;;  %v744_v13 = vpop.f32.mrb[27].mxu0  ;;  %v785_v14 = vpop.f32.mrb[27].mxu1  ;;  %v1865_v24 = vmul.f32 -1.442695, %v789_v10 }
 0x389   :  { %v1864_v16 = vmul.f32 -1.442695, %v788_v37  ;;  %v3148_v40 = vld [vmem:[#allocation2_spill] sm:$0xff] }
 0x38a   :  { %2113 = vpow2.f32 %v1863_v32  ;;  %v3149_v32 = vld [vmem:[#allocation3_spill] sm:$0xff] }
 0x38b   :  { %2115 = vpow2.f32 %v1864_v16 }
 0x38c   :  { %2117 = vtanh.f32 %v790_v39 }
 0x38d   :  { %2119 = vpow2.f32 %v1865_v24 }
 0x394   :  { %v2114_v17 = vpop.eup %2113 }
 0x395   :  { %v794_v38 = vadd.f32 1.0, %v2114_v17  ;;  %v2116_v19 = vpop.eup %2115 }
 0x396   :  { %v800_v20 = vadd.f32 1.0, %v2116_v19  ;;  %v2118_v21 = vpop.eup %2117 }
 0x397   :  { %2121 = vrcp.f32 %v794_v38  ;;  %v2120_v50 = vpop.eup %2119 }
 0x398   :  { %2123 = vrcp.f32 %v800_v20  ;;  %v806_v53 = vadd.f32 1.0, %v2120_v50 }
 0x39a   :  { %2125 = vrcp.f32 %v806_v53 }
 0x3a1   :  { %v2122_v22 = vpop.eup %2121 }
 0x3a2   :  { %v811_v26 = vmul.f32 %v2122_v22, %v2118_v21  ;;  %v2124_v51 = vpop.eup %2123 }
 0x3a3   :  { %v810_v56 = vmul.f32 %v2124_v51, %v2712_v52 }
 0x3a4   :  { %v2126_v1 = vpop.eup %2125 }
 0x3a5   :  { %v2754_v63 = vadd.f32 %v811_v26, %v810_v56 }
 0x3a7   :  { %2127 = vtanh.f32 %v2754_v63 }
 0x3b1   :  { %v2128_v29 = vpop.eup %2127 }
 0x3b2   :  { %v814_v4 = vmul.f32 %v2128_v29, %v2126_v1 }
 0x3b4   :  { %v815_v9 = vpack.c.bf16 %v814_v4, %v814_v4 }
 0x3b6   :  { %849 = vmatmul.mubr.bf16.vlgmr.msra.gmra.mrb[28].mxu0 %v815_v9  ;;  %890 = vmatmul.mubr.bf16.vlgmr.msra.gmra.mrb[28].mxu1 %v815_v9 }
 0x3b7   :  { %928 = vmatpush1.bf16.msra.mxu0 %v2371_v27  ;;  %969 = vmatpush1.bf16.msra.mxu1 %v2376_v28 }
 0x3b8   :  { %929 = vmatprep.subr.bf16.mxu0 %v2381_v30  ;;  %970 = vmatprep.subr.bf16.mxu1 %v2386_v31 }
 0x3b9   :  { %959 = vmatprep.mubr.bf16.mxu0 %v3147_v0  ;;  %1000 = vmatprep.mubr.bf16.mxu1 %v3147_v0 }
 0x3bb   :  { %930 = vmatpush1.bf16.msra.mxu0 %v2397_v33  ;;  %971 = vmatpush1.bf16.msra.mxu1 %v2402_v34 }
 0x3bc   :  { %931 = vmatprep.subr.bf16.mxu0 %v2409_v35  ;;  %972 = vmatprep.subr.bf16.mxu1 %v2414_v36 }
 0x3bf   :  { %932 = vmatpush1.bf16.msra.mxu0 %v2425_v41  ;;  %973 = vmatpush1.bf16.msra.mxu1 %v2430_v42 }
 0x3c0   :  { %933 = vmatprep.subr.bf16.mxu0 %v2437_v44  ;;  %974 = vmatprep.subr.bf16.mxu1 %v2442_v45 }
 0x3c3   :  { %934 = vmatpush1.bf16.msra.mxu0 %v2453_v46  ;;  %975 = vmatpush1.bf16.msra.mxu1 %v2458_v47 }
 0x3c4   :  { %935 = vmatprep.subr.bf16.mxu0 %v2465_v48  ;;  %976 = vmatprep.subr.bf16.mxu1 %v2470_v49 }
 0x3c7   :  { %936 = vmatpush1.bf16.msra.mxu0 %v2481_v54  ;;  %977 = vmatpush1.bf16.msra.mxu1 %v2486_v55 }
 0x3c8   :  { %937 = vmatprep.subr.bf16.mxu0 %v2493_v57  ;;  %978 = vmatprep.subr.bf16.mxu1 %v2498_v58 }
 0x3cb   :  { %938 = vmatpush1.bf16.msra.mxu0 %v2509_v59  ;;  %979 = vmatpush1.bf16.msra.mxu1 %v2514_v60 }
 0x3cc   :  { %939 = vmatprep.subr.bf16.mxu0 %v2521_v61  ;;  %980 = vmatprep.subr.bf16.mxu1 %v2526_v62 }
 0x3cf   :  { %940 = vmatpush1.bf16.msra.mxu0 %v2537_v2  ;;  %981 = vmatpush1.bf16.msra.mxu1 %v2542_v3 }
 0x3d0   :  { %941 = vmatprep.subr.bf16.mxu0 %v2549_v5  ;;  %982 = vmatprep.subr.bf16.mxu1 %v2554_v6 }
 0x3d3   :  { %942 = vmatpush1.bf16.msra.mxu0 %v2563_v7  ;;  %983 = vmatpush1.bf16.msra.mxu1 %v2568_v8 }
 0x3d4   :  { %1038 = vmatprep.subr.bf16.mxu0 %v2347_v15  ;;  %1079 = vmatprep.subr.bf16.mxu1 %v2358_v18 }
 0x489   :  { %v850_v52 = vpop.f32.mrb[28].mxu0  ;;  %v891_v10 = vpop.f32.mrb[28].mxu1 }
 0x48a   :  { %v898_v11 = vadd.f32 %v850_v52, %v2630_v23  ;;  %v900_v12 = vadd.f32 %v891_v10, %v2632_v25  ;;  %v852_v37 = vpop.f32.mrb[29].mxu0  ;;  %v893_v39 = vpop.f32.mrb[29].mxu1 }
 0x48b   :  { %v899_v43 = vadd.f32 %v852_v37, %v3148_v40  ;;  %v901_v13 = vadd.f32 %v893_v39, %v3149_v32  ;;  %v854_v14 = vpop.f32.mrb[30].mxu0  ;;  %v895_v16 = vpop.f32.mrb[30].mxu1  ;;  %v3150_v37 = vld [vmem:[#allocation4_spill] sm:$0xff]  ;;  %v3151_v40 = vld [vmem:[#allocation5_spill] sm:$0xff] }
 0x48c   :  { %v1866_v24 = vmul.f32 -1.442695, %v898_v11  ;;  %v855_v17 = vpop.f32.mrb[31].mxu0  ;;  %v896_v38 = vpop.f32.mrb[31].mxu1  ;;  %v1868_v19 = vmul.f32 -1.442695, %v900_v12 }
 0x48d   :  { %v1867_v15 = vmul.f32 -1.442695, %v899_v43  ;;  %v3152_v14 = vld [vmem:[#allocation6_spill] sm:$0xff] }
 0x48e   :  { %2129 = vpow2.f32 %v1866_v24  ;;  %v3153_v24 = vld [vmem:[#allocation7_spill] sm:$0xff] }
 0x48f   :  { %2131 = vpow2.f32 %v1867_v15 }
 0x490   :  { %2133 = vtanh.f32 %v901_v13 }
 0x491   :  { %2135 = vpow2.f32 %v1868_v19 }
 0x498   :  { %v2130_v20 = vpop.eup %2129 }
 0x499   :  { %v905_v21 = vadd.f32 1.0, %v2130_v20  ;;  %v2132_v23 = vpop.eup %2131 }
 0x49a   :  { %v911_v25 = vadd.f32 1.0, %v2132_v23  ;;  %v2134_v50 = vpop.eup %2133 }
 0x49b   :  { %2137 = vrcp.f32 %v905_v21  ;;  %v2136_v22 = vpop.eup %2135 }
 0x49c   :  { %2139 = vrcp.f32 %v911_v25  ;;  %v917_v56 = vadd.f32 1.0, %v2136_v22 }
 0x49e   :  { %2141 = vrcp.f32 %v917_v56 }
 0x4a5   :  { %v2138_v26 = vpop.eup %2137 }
 0x4a6   :  { %v922_v51 = vmul.f32 %v2138_v26, %v2134_v50  ;;  %v2140_v53 = vpop.eup %2139 }
 0x4a7   :  { %v921_v1 = vmul.f32 %v2140_v53, %v2754_v63  ;;  %v2834_v63 = vld [vmem:[%s3113_s3 + $0x4] ss:$16 sps:$4 sm:$0xff]  }
 0x4a8   :  { %v2142_v4 = vpop.eup %2141 }
 0x4a9   :  { %v2796_v29 = vadd.f32 %v922_v51, %v921_v1 }
 0x4ab   :  { %2143 = vtanh.f32 %v2796_v29 }
 0x4b5   :  { %v2144_v9 = vpop.eup %2143 }
 0x4b6   :  { %v925_v52 = vmul.f32 %v2144_v9, %v2142_v4 }
 0x4b8   :  { %v926_v10 = vpack.c.bf16 %v925_v52, %v925_v52 }
 0x4ba   :  { %960 = vmatmul.mubr.bf16.vlgmr.msra.gmra.mrb[32].mxu0 %v926_v10  ;;  %1001 = vmatmul.mubr.bf16.vlgmr.msra.gmra.mrb[32].mxu1 %v926_v10 }
 0x4bb   :  { %1039 = vmatpush1.bf16.msra.mxu0 %v2371_v27  ;;  %1080 = vmatpush1.bf16.msra.mxu1 %v2376_v28 }
 0x4bc   :  { %1040 = vmatprep.subr.bf16.mxu0 %v2381_v30  ;;  %1081 = vmatprep.subr.bf16.mxu1 %v2386_v31 }
 0x4bd   :  { %1070 = vmatprep.mubr.bf16.mxu0 %v3147_v0  ;;  %1111 = vmatprep.mubr.bf16.mxu1 %v3147_v0 }
 0x4bf   :  { %1041 = vmatpush1.bf16.msra.mxu0 %v2397_v33  ;;  %1082 = vmatpush1.bf16.msra.mxu1 %v2402_v34 }
 0x4c0   :  { %1042 = vmatprep.subr.bf16.mxu0 %v2409_v35  ;;  %1083 = vmatprep.subr.bf16.mxu1 %v2414_v36 }
 0x4c3   :  { %1043 = vmatpush1.bf16.msra.mxu0 %v2425_v41  ;;  %1084 = vmatpush1.bf16.msra.mxu1 %v2430_v42 }
 0x4c4   :  { %1044 = vmatprep.subr.bf16.mxu0 %v2437_v44  ;;  %1085 = vmatprep.subr.bf16.mxu1 %v2442_v45 }
 0x4c7   :  { %1045 = vmatpush1.bf16.msra.mxu0 %v2453_v46  ;;  %1086 = vmatpush1.bf16.msra.mxu1 %v2458_v47 }
 0x4c8   :  { %1046 = vmatprep.subr.bf16.mxu0 %v2465_v48  ;;  %1087 = vmatprep.subr.bf16.mxu1 %v2470_v49 }
 0x4cb   :  { %1047 = vmatpush1.bf16.msra.mxu0 %v2481_v54  ;;  %1088 = vmatpush1.bf16.msra.mxu1 %v2486_v55 }
 0x4cc   :  { %1048 = vmatprep.subr.bf16.mxu0 %v2493_v57  ;;  %1089 = vmatprep.subr.bf16.mxu1 %v2498_v58 }
 0x4cf   :  { %1049 = vmatpush1.bf16.msra.mxu0 %v2509_v59  ;;  %1090 = vmatpush1.bf16.msra.mxu1 %v2514_v60 }
 0x4d0   :  { %1050 = vmatprep.subr.bf16.mxu0 %v2521_v61  ;;  %1091 = vmatprep.subr.bf16.mxu1 %v2526_v62 }
 0x4d3   :  { %1051 = vmatpush1.bf16.msra.mxu0 %v2537_v2  ;;  %1092 = vmatpush1.bf16.msra.mxu1 %v2542_v3 }
 0x4d4   :  { %1052 = vmatprep.subr.bf16.mxu0 %v2549_v5  ;;  %1093 = vmatprep.subr.bf16.mxu1 %v2554_v6 }
 0x4d7   :  { %1053 = vmatpush1.bf16.msra.mxu0 %v2563_v7  ;;  %1094 = vmatpush1.bf16.msra.mxu1 %v2568_v8 }
 0x4d8   :  { %1149 = vmatprep.subr.bf16.mxu0 %v2834_v63  ;;  %1190 = vmatprep.subr.bf16.mxu1 %v2358_v18 }
 0x58d   :  { %v961_v11 = vpop.f32.mrb[32].mxu0  ;;  %v1002_v12 = vpop.f32.mrb[32].mxu1 }
 0x58e   :  { %v1009_v39 = vadd.f32 %v961_v11, %v3150_v37  ;;  %v1011_v43 = vadd.f32 %v1002_v12, %v3151_v40  ;;  %v963_v32 = vpop.f32.mrb[33].mxu0  ;;  %v1004_v13 = vpop.f32.mrb[33].mxu1 }
 0x58f   :  { %v1010_v16 = vadd.f32 %v963_v32, %v3152_v14  ;;  %v1012_v17 = vadd.f32 %v1004_v13, %v3153_v24  ;;  %v965_v38 = vpop.f32.mrb[34].mxu0  ;;  %v1006_v15 = vpop.f32.mrb[34].mxu1  ;;  %v2211_v14 = vld [vmem:[%s3113_s3] ss:$16 sps:$4 sm:$0xff]   ;;  %v2213_v24 = vld [vmem:[%s3113_s3 + $0x24] ss:$16 sps:$4 sm:$0xff]  }
 0x590   :  { %v1869_v19 = vmul.f32 -1.442695, %v1009_v39  ;;  %v966_v20 = vpop.f32.mrb[35].mxu0  ;;  %v1007_v21 = vpop.f32.mrb[35].mxu1  ;;  %v1871_v18 = vmul.f32 -1.442695, %v1011_v43 }
 0x591   :  { %v1870_v23 = vmul.f32 -1.442695, %v1010_v16  ;;  %v2212_v16 = vld [vmem:[%s3113_s3 + $0x8] ss:$16 sps:$4 sm:$0xff]   ;;  %v2215_v38 = vld [vmem:[%s3113_s3 + $0x20] ss:$16 sps:$4 sm:$0xff]  }
 0x592   :  { %2145 = vpow2.f32 %v1869_v19  ;;  %v2216_v15 = vld [vmem:[%s3113_s3 + $0x28] ss:$16 sps:$4 sm:$0xff]   ;;  %v2217_v19 = vld [vmem:[%s3113_s3 + $0x44] ss:$16 sps:$4 sm:$0xff]   ;;  %v2218_v20 = vld [vmem:[%s3113_s3 + $0x4c] ss:$16 sps:$4 sm:$0xff]  }
 0x593   :  { %2147 = vpow2.f32 %v1870_v23  ;;  %v2220_v21 = vld [vmem:[%s3113_s3 + $0x48] ss:$16 sps:$4 sm:$0xff]   ;;  %v2221_v23 = vld [vmem:[%s3113_s3 + $0x64] ss:$16 sps:$4 sm:$0xff]  }
 0x594   :  { %2149 = vtanh.f32 %v1012_v17  ;;  %v2214_v17 = vld [vmem:[%s3113_s3 + $0x2c] ss:$16 sps:$4 sm:$0xff]  }
 0x595   :  { %2151 = vpow2.f32 %v1871_v18  ;;  %v2222_v18 = vld [vmem:[%s3113_s3 + $0x6c] ss:$16 sps:$4 sm:$0xff]  }
 0x59c   :  { %v2146_v25 = vpop.eup %2145 }
 0x59d   :  { %v1016_v50 = vadd.f32 1.0, %v2146_v25  ;;  %v2148_v22 = vpop.eup %2147  ;;  %v2223_v25 = vld [vmem:[%s3113_s3 + $0x60] ss:$16 sps:$4 sm:$0xff]  }
 0x59e   :  { %v1022_v26 = vadd.f32 1.0, %v2148_v22  ;;  %v2150_v51 = vpop.eup %2149  ;;  %v2225_v22 = vld [vmem:[%s3113_s3 + $0x84] ss:$16 sps:$4 sm:$0xff]  }
 0x59f   :  { %2153 = vrcp.f32 %v1016_v50  ;;  %v2152_v53 = vpop.eup %2151  ;;  %v2224_v50 = vld [vmem:[%s3113_s3 + $0x68] ss:$16 sps:$4 sm:$0xff]  }
 0x5a0   :  { %2155 = vrcp.f32 %v1022_v26  ;;  %v1028_v9 = vadd.f32 1.0, %v2152_v53  ;;  %v2226_v26 = vld [vmem:[%s3113_s3 + $0x8c] ss:$16 sps:$4 sm:$0xff]   ;;  %v2228_v53 = vld [vmem:[%s3113_s3 + $0x88] ss:$16 sps:$4 sm:$0xff]  }
 0x5a2   :  { %2157 = vrcp.f32 %v1028_v9  ;;  %v2232_v9 = vld [vmem:[%s3113_s3 + $0xa8] ss:$16 sps:$4 sm:$0xff]  }
 0x5a9   :  { %v2154_v56 = vpop.eup %2153 }
 0x5aa   :  { %v1033_v1 = vmul.f32 %v2154_v56, %v2150_v51  ;;  %v2156_v4 = vpop.eup %2155  ;;  %v2227_v51 = vld [vmem:[%s3113_s3 + $0x80] ss:$16 sps:$4 sm:$0xff]   ;;  %v2229_v56 = vld [vmem:[%s3113_s3 + $0xa4] ss:$16 sps:$4 sm:$0xff]  }
 0x5ab   :  { %v1032_v52 = vmul.f32 %v2156_v4, %v2796_v29  ;;  %v2231_v4 = vld [vmem:[%s3113_s3 + $0xa0] ss:$16 sps:$4 sm:$0xff]  }
 0x5ac   :  { %v2158_v11 = vpop.eup %2157 }
 0x5ad   :  { %v2843_v10 = vadd.f32 %v1033_v1, %v1032_v52  ;;  %v2230_v1 = vld [vmem:[%s3113_s3 + $0xac] ss:$16 sps:$4 sm:$0xff]   ;;  %v2233_v52 = vld [vmem:[%s3113_s3 + $0xc4] ss:$16 sps:$4 sm:$0xff]  }
 0x5af   :  { %2159 = vtanh.f32 %v2843_v10 }
 0x5b9   :  { %v2160_v12 = vpop.eup %2159 }
 0x5ba   :  { %v1036_v37 = vmul.f32 %v2160_v12, %v2158_v11  ;;  %v2235_v11 = vld [vmem:[%s3113_s3 + $0xc0] ss:$16 sps:$4 sm:$0xff]   ;;  %v2236_v12 = vld [vmem:[%s3113_s3 + $0xc8] ss:$16 sps:$4 sm:$0xff]  }
 0x5bc   :  { %v1037_v39 = vpack.c.bf16 %v1036_v37, %v1036_v37  ;;  %v2237_v37 = vld [vmem:[%s3113_s3 + $0xe4] ss:$16 sps:$4 sm:$0xff]  }
 0x5be   :  { %1071 = vmatmul.mubr.bf16.vlgmr.msra.gmra.mrb[36].mxu0 %v1037_v39  ;;  %1112 = vmatmul.mubr.bf16.vlgmr.msra.gmra.mrb[36].mxu1 %v1037_v39  ;;  %v2238_v39 = vld [vmem:[%s3113_s3 + $0xec] ss:$16 sps:$4 sm:$0xff]  }
 0x5bf   :  { %1150 = vmatpush1.bf16.msra.mxu0 %v2371_v27  ;;  %1191 = vmatpush1.bf16.msra.mxu1 %v2376_v28  ;;  %v2210_v27 = vld [vmem:[%s3113_s3 + $0xc] ss:$16 sps:$4 sm:$0xff]  }
 0x5c0   :  { %1151 = vmatprep.subr.bf16.mxu0 %v2381_v30  ;;  %1192 = vmatprep.subr.bf16.mxu1 %v2386_v31  ;;  %v3154_v31 = vld [vmem:[#allocation8_spill] sm:$0xff] }
 0x5c1   :  { %1181 = vmatprep.mubr.bf16.mxu0 %v3147_v0  ;;  %1222 = vmatprep.mubr.bf16.mxu1 %v3147_v0 }
 0x5c3   :  { %1152 = vmatpush1.bf16.msra.mxu0 %v2397_v33  ;;  %1193 = vmatpush1.bf16.msra.mxu1 %v2402_v34  ;;  %v3155_v34 = vld [vmem:[#allocation9_spill] sm:$0xff] }
 0x5c4   :  { %1153 = vmatprep.subr.bf16.mxu0 %v2409_v35  ;;  %1194 = vmatprep.subr.bf16.mxu1 %v2414_v36 }
 0x5c7   :  { %1154 = vmatpush1.bf16.msra.mxu0 %v2425_v41  ;;  %1195 = vmatpush1.bf16.msra.mxu1 %v2430_v42  ;;  %v3156_v42 = vld [vmem:[#allocation10_spill] sm:$0xff] }
 0x5c8   :  { %1155 = vmatprep.subr.bf16.mxu0 %v2437_v44  ;;  %1196 = vmatprep.subr.bf16.mxu1 %v2442_v45  ;;  %v3157_v45 = vld [vmem:[#allocation11_spill] sm:$0xff] }
 0x5cb   :  { %1156 = vmatpush1.bf16.msra.mxu0 %v2453_v46  ;;  %1197 = vmatpush1.bf16.msra.mxu1 %v2458_v47 }
 0x5cc   :  { %1157 = vmatprep.subr.bf16.mxu0 %v2465_v48  ;;  %1198 = vmatprep.subr.bf16.mxu1 %v2470_v49 }
 0x5cf   :  { %1158 = vmatpush1.bf16.msra.mxu0 %v2481_v54  ;;  %1199 = vmatpush1.bf16.msra.mxu1 %v2486_v55 }
 0x5d0   :  { %1159 = vmatprep.subr.bf16.mxu0 %v2493_v57  ;;  %1200 = vmatprep.subr.bf16.mxu1 %v2498_v58 }
 0x5d3   :  { %1160 = vmatpush1.bf16.msra.mxu0 %v2509_v59  ;;  %1201 = vmatpush1.bf16.msra.mxu1 %v2514_v60 }
 0x5d4   :  { %1161 = vmatprep.subr.bf16.mxu0 %v2521_v61  ;;  %1202 = vmatprep.subr.bf16.mxu1 %v2526_v62 }
 0x5d7   :  { %1162 = vmatpush1.bf16.msra.mxu0 %v2537_v2  ;;  %1203 = vmatpush1.bf16.msra.mxu1 %v2542_v3 }
 0x5d8   :  { %1163 = vmatprep.subr.bf16.mxu0 %v2549_v5  ;;  %1204 = vmatprep.subr.bf16.mxu1 %v2554_v6 }
 0x5db   :  { %1164 = vmatpush1.bf16.msra.mxu0 %v2563_v7  ;;  %1205 = vmatpush1.bf16.msra.mxu1 %v2568_v8 }
 0x5dc   :  { %1260 = vmatprep.subr.bf16.mxu0 %v2834_v63  ;;  %1301 = vmatprep.subr.bf16.mxu1 %v2210_v27  ;;  %v2239_v27 = vld [vmem:[%s3113_s3 + $0xe0] ss:$16 sps:$4 sm:$0xff]  }
 0x691   :  { %v1072_v28 = vpop.f32.mrb[36].mxu0  ;;  %v1113_v30 = vpop.f32.mrb[36].mxu1 }
 0x692   :  { %v1120_v33 = vadd.f32 %v1072_v28, %v3154_v31  ;;  %v1122_v35 = vadd.f32 %v1113_v30, %v3155_v34  ;;  %v1074_v36 = vpop.f32.mrb[37].mxu0  ;;  %v1115_v41 = vpop.f32.mrb[37].mxu1  ;;  %v2240_v28 = vld [vmem:[%s3113_s3 + $0xe8] ss:$16 sps:$4 sm:$0xff]   ;;  %v2243_v30 = vmov 0.0|0.0   ;;  %v3158_v34 = vld [vmem:[#allocation12_spill] sm:$0xff] }
 0x693   :  { %v1121_v44 = vadd.f32 %v1074_v36, %v3156_v42  ;;  %v1123_v46 = vadd.f32 %v1115_v41, %v3157_v45  ;;  %v1076_v47 = vpop.f32.mrb[38].mxu0  ;;  %v1117_v48 = vpop.f32.mrb[38].mxu1  ;;  %v3159_v36 = vld [vmem:[#allocation13_spill] sm:$0xff]  ;;  %v3160_v45 = vld [vmem:[#allocation14_spill] sm:$0xff] }
 0x694   :  { %v1872_v49 = vmul.f32 -1.442695, %v1120_v33  ;;  %v1077_v54 = vpop.f32.mrb[39].mxu0  ;;  %v1118_v55 = vpop.f32.mrb[39].mxu1  ;;  %v1874_v58 = vmul.f32 -1.442695, %v1122_v35 }
 0x695   :  { %v1873_v57 = vmul.f32 -1.442695, %v1121_v44  ;;  %v3161_v47 = vld [vmem:[#allocation15_spill] sm:$0xff] }
 0x696   :  { %2161 = vpow2.f32 %v1872_v49 }
 0x697   :  { %2163 = vpow2.f32 %v1873_v57 }
 0x698   :  { %2165 = vtanh.f32 %v1123_v46 }
 0x699   :  { %2167 = vpow2.f32 %v1874_v58 }
 0x6a0   :  { %v2162_v59 = vpop.eup %2161 }
 0x6a1   :  { %v1127_v60 = vadd.f32 1.0, %v2162_v59  ;;  %v2164_v61 = vpop.eup %2163 }
 0x6a2   :  { %v1133_v62 = vadd.f32 1.0, %v2164_v61  ;;  %v2166_v2 = vpop.eup %2165 }
 0x6a3   :  { %2169 = vrcp.f32 %v1127_v60  ;;  %v2168_v3 = vpop.eup %2167 }
 0x6a4   :  { %2171 = vrcp.f32 %v1133_v62  ;;  %v1139_v8 = vadd.f32 1.0, %v2168_v3 }
 0x6a6   :  { %2173 = vrcp.f32 %v1139_v8 }
 0x6ad   :  { %v2170_v5 = vpop.eup %2169 }
 0x6ae   :  { %v1144_v6 = vmul.f32 %v2170_v5, %v2166_v2  ;;  %v2172_v7 = vpop.eup %2171 }
 0x6af   :  { %v1143_v29 = vmul.f32 %v2172_v7, %v2843_v10  ;;  %v2234_v10 = vld [vmem:[%s3113_s3 + $0xcc] ss:$16 sps:$4 sm:$0xff]  }
 0x6b0   :  { %v2174_v40 = vpop.eup %2173 }
 0x6b1   :  { %v2887_v63 = vadd.f32 %v1144_v6, %v1143_v29 }
 0x6b3   :  { %2175 = vtanh.f32 %v2887_v63 }
 0x6bd   :  { %v2176_v43 = vpop.eup %2175 }
 0x6be   :  { %v1147_v32 = vmul.f32 %v2176_v43, %v2174_v40 }
 0x6c0   :  { %v1148_v13 = vpack.c.bf16 %v1147_v32, %v1147_v32 }
 0x6c2   :  { %1182 = vmatmul.mubr.bf16.vlgmr.msra.gmra.mrb[40].mxu0 %v1148_v13  ;;  %1223 = vmatmul.mubr.bf16.vlgmr.msra.gmra.mrb[40].mxu1 %v1148_v13 }
 0x6c3   :  { %1261 = vmatpush1.bf16.msra.mxu0 %v2211_v14  ;;  %1302 = vmatpush1.bf16.msra.mxu1 %v2212_v16  ;;  %v1371_v14 = vld [vmem:[%s3114_s4] sm:$0xff]  ;;  %v1372_v16 = vld [vmem:[%s3114_s4 + $0x8] sm:$0x1] }
 0x6c4   :  { %1262 = vmatprep.subr.bf16.mxu0 %v2213_v24  ;;  %1303 = vmatprep.subr.bf16.mxu1 %v2214_v17 }
 0x6c5   :  { %1292 = vmatprep.mubr.bf16.mxu0 %v3147_v0  ;;  %1333 = vmatprep.mubr.bf16.mxu1 %v3147_v0  ;;  %v2219_v0 = vld [vmem:[%s3113_s3 + $0x40] ss:$16 sps:$4 sm:$0xff]  }
 0x6c7   :  { %1263 = vmatpush1.bf16.msra.mxu0 %v2215_v38  ;;  %1304 = vmatpush1.bf16.msra.mxu1 %v2216_v15  ;;  %v1986_v38 = vpack.c.bf16 %v1372_v16, %v1371_v14 }
 0x6c8   :  { %1264 = vmatprep.subr.bf16.mxu0 %v2217_v19  ;;  %1305 = vmatprep.subr.bf16.mxu1 %v2218_v20  ;;  %v1370_v19 = vld [vmem:[%s3115_s1] sm:$0xff] }
 0x6c9   :  { %v1459_v20 = vld [vmem:[%s3116_s6] sm:$0xff] }
 0x6cb   :  { %1265 = vmatpush1.bf16.msra.mxu0 %v2219_v0  ;;  %1306 = vmatpush1.bf16.msra.mxu1 %v2220_v21  ;;  %v1460_v0 = vld [vmem:[%s3116_s6 + $0x8] sm:$0xff] }
 0x6cc   :  { %1266 = vmatprep.subr.bf16.mxu0 %v2221_v23  ;;  %1307 = vmatprep.subr.bf16.mxu1 %v2222_v18  ;;  %v1990_v21 = vpack.c.bf16 %v1460_v0, %v1459_v20  ;;  %v1543_v23 = vld [vmem:[%s3117_s8] sm:$0xff]  ;;  %v1544_v18 = vld [vmem:[%s3117_s8 + $0x8] sm:$0xff] }
 0x6cf   :  { %1267 = vmatpush1.bf16.msra.mxu0 %v2223_v25  ;;  %1308 = vmatpush1.bf16.msra.mxu1 %v2224_v50  ;;  %v1993_v25 = vpack.c.bf16 %v1544_v18, %v1543_v23  ;;  %v1545_v50 = vld [vmem:[%s3117_s8 + $0x10] sm:$0xff] }
 0x6d0   :  { %1268 = vmatprep.subr.bf16.mxu0 %v2225_v22  ;;  %1309 = vmatprep.subr.bf16.mxu1 %v2226_v26  ;;  %v1546_v22 = vld [vmem:[%s3117_s8 + $0x18] sm:$0xff] }
 0x6d1   :  { %v1996_v26 = vpack.c.bf16 %v1546_v22, %v1545_v50  ;;  %v1884_v50 = vld [vmem:[%s3120_s7] ss:$0 sm:$0xff] }
 0x6d3   :  { %1269 = vmatpush1.bf16.msra.mxu0 %v2227_v51  ;;  %1310 = vmatpush1.bf16.msra.mxu1 %v2228_v53  ;;  %v1547_v51 = vld [vmem:[%s3117_s8 + $0x20] sm:$0xff]  ;;  %v1548_v53 = vld [vmem:[%s3117_s8 + $0x28] sm:$0xff] }
 0x6d4   :  { %1270 = vmatprep.subr.bf16.mxu0 %v2229_v56  ;;  %1311 = vmatprep.subr.bf16.mxu1 %v2230_v1  ;;  %v1999_v56 = vpack.c.bf16 %v1548_v53, %v1547_v51  ;;  %v1549_v1 = vld [vmem:[%s3117_s8 + $0x30] sm:$0xff] }
 0x6d7   :  { %1271 = vmatpush1.bf16.msra.mxu0 %v2231_v4  ;;  %1312 = vmatpush1.bf16.msra.mxu1 %v2232_v9  ;;  %v1550_v4 = vld [vmem:[%s3117_s8 + $0x38] sm:$0xff] }
 0x6d8   :  { %1272 = vmatprep.subr.bf16.mxu0 %v2233_v52  ;;  %1313 = vmatprep.subr.bf16.mxu1 %v2234_v10  ;;  %v2002_v9 = vpack.c.bf16 %v1550_v4, %v1549_v1  ;;  %v1551_v52 = vld [vmem:[%s3117_s8 + $0x40] sm:$0xff]  ;;  %v1552_v10 = vld [vmem:[%s3117_s8 + $0x48] sm:$0xff] }
 0x6d9   :  { %v1713_v1 = vld [vmem:[%s3121_s11] sm:$0xff]  ;;  %v1714_v4 = vld [vmem:[%s3121_s11 + $0x8] sm:$0xff] }
 0x6db   :  { %1273 = vmatpush1.bf16.msra.mxu0 %v2235_v11  ;;  %1314 = vmatpush1.bf16.msra.mxu1 %v2236_v12  ;;  %v2005_v11 = vpack.c.bf16 %v1552_v10, %v1551_v52  ;;  %v1553_v12 = vld [vmem:[%s3117_s8 + $0x50] sm:$0xff] }
 0x6dc   :  { %1274 = vmatprep.subr.bf16.mxu0 %v2237_v37  ;;  %1315 = vmatprep.subr.bf16.mxu1 %v2238_v39  ;;  %v1554_v37 = vld [vmem:[%s3117_s8 + $0x58] sm:$0xff]  ;;  %v1715_v52 = vld [vmem:[%s3121_s11 + $0x10] sm:$0xff] }
 0x6dd   :  { %v2008_v39 = vpack.c.bf16 %v1554_v37, %v1553_v12  ;;  %v1887_v12 = vld [vmem:[%s3122_s10] ss:$0 sm:$0xff] }
 0x6df   :  { %1275 = vmatpush1.bf16.msra.mxu0 %v2239_v27  ;;  %1316 = vmatpush1.bf16.msra.mxu1 %v2240_v28  ;;  %v1555_v27 = vld [vmem:[%s3117_s8 + $0x60] sm:$0xff]  ;;  %v1556_v28 = vld [vmem:[%s3117_s8 + $0x68] sm:$0xff] }
 0x6e0   :  { %1985 = vmatprep.subr.bf16.mxu0 %v2243_v30  ;;  %1992 = vmatprep.subr.bf16.mxu1 %v2243_v30 }
 0x795   :  { %v1183_v31 = vpop.f32.mrb[40].mxu0  ;;  %v1224_v33 = vpop.f32.mrb[40].mxu1 }
 0x796   :  { %v1231_v35 = vadd.f32 %v1183_v31, %v3158_v34  ;;  %v1233_v41 = vadd.f32 %v1224_v33, %v3159_v36  ;;  %v1185_v42 = vpop.f32.mrb[41].mxu0  ;;  %v1226_v44 = vpop.f32.mrb[41].mxu1  ;;  %v2011_v31 = vpack.c.bf16 %v1556_v28, %v1555_v27  ;;  %v1557_v33 = vld [vmem:[%s3117_s8 + $0x70] sm:$0xff]  ;;  %v1558_v34 = vld [vmem:[%s3117_s8 + $0x78] sm:$0xff]  ;;  %v1888_v28 = vld [vmem:[%s3123_s12] ss:$0 sm:$0xff] }
 0x797   :  { %v1232_v46 = vadd.f32 %v1185_v42, %v3160_v45  ;;  %v1234_v48 = vadd.f32 %v1226_v44, %v3161_v47  ;;  %v1187_v49 = vpop.f32.mrb[42].mxu0  ;;  %v1228_v54 = vpop.f32.mrb[42].mxu1  ;;  %v3163_v42 = vld [vmem:[#allocation16_spill] sm:$0xff]  ;;  %v3164_v45 = vld [vmem:[#allocation17_spill] sm:$0xff] }
 0x798   :  { %v1875_v55 = vmul.f32 -1.442695, %v1231_v35  ;;  %v1188_v57 = vpop.f32.mrb[43].mxu0  ;;  %v1229_v58 = vpop.f32.mrb[43].mxu1  ;;  %v1877_v60 = vmul.f32 -1.442695, %v1233_v41  ;;  %v2014_v35 = vpack.c.bf16 %v1558_v34, %v1557_v33 }
 0x799   :  { %v1876_v59 = vmul.f32 -1.442695, %v1232_v46  ;;  %v3165_v49 = vld [vmem:[#allocation18_spill] sm:$0xff] }
 0x79a   :  { %2177 = vpow2.f32 %v1875_v55  ;;  %v3166_v55 = vld [vmem:[#allocation19_spill] sm:$0xff] }
 0x79b   :  { %2179 = vpow2.f32 %v1876_v59 }
 0x79c   :  { %2181 = vtanh.f32 %v1234_v48 }
 0x79d   :  { %2183 = vpow2.f32 %v1877_v60 }
 0x7a4   :  { %v2178_v61 = vpop.eup %2177 }
 0x7a5   :  { %v1238_v62 = vadd.f32 1.0, %v2178_v61  ;;  %v2180_v2 = vpop.eup %2179 }
 0x7a6   :  { %v1244_v3 = vadd.f32 1.0, %v2180_v2  ;;  %v2182_v5 = vpop.eup %2181 }
 0x7a7   :  { %2185 = vrcp.f32 %v1238_v62  ;;  %v2184_v6 = vpop.eup %2183 }
 0x7a8   :  { %2187 = vrcp.f32 %v1244_v3  ;;  %v1250_v40 = vadd.f32 1.0, %v2184_v6  ;;  %v1881_v3 = vld [vmem:[%s3118_s5] ss:$0 sm:$0xff] }
 0x7aa   :  { %2189 = vrcp.f32 %v1250_v40 }
 0x7b1   :  { %v2186_v7 = vpop.eup %2185 }
 0x7b2   :  { %v1255_v8 = vmul.f32 %v2186_v7, %v2182_v5  ;;  %v2188_v29 = vpop.eup %2187 }
 0x7b3   :  { %v1254_v43 = vmul.f32 %v2188_v29, %v2887_v63  ;;  %v3162_v63 = vmov 0.0  }
 0x7b4   :  { %v2190_v13 = vpop.eup %2189 }
 0x7b5   :  { %v2989_v32 = vadd.f32 %v1255_v8, %v1254_v43 }
 0x7b7   :  { %2191 = vtanh.f32 %v2989_v32 }
 0x7c1   :  { %v2192_v24 = vpop.eup %2191 }
 0x7c2   :  { %v1258_v17 = vmul.f32 %v2192_v24, %v2190_v13 }
 0x7c4   :  { %v1259_v15 = vpack.c.bf16 %v1258_v17, %v1258_v17 }
 0x7c6   :  { %1293 = vmatmul.mubr.bf16.vlgmr.msra.gmra.mrb[44].mxu0 %v1259_v15  ;;  %1334 = vmatmul.mubr.bf16.vlgmr.msra.gmra.mrb[44].mxu1 %v1259_v15 }
 0x7c7   :  { %1988 = vmatpush3.bf16.msk.msra.mxu0 %vm1987_vm12, %v1986_v38  ;;  %1924 = vmatprep.mubr.msk.f32.mxu0 %vm2245_vm13, %v3162_v63 }
 0x7c8   :  { %1989 = vmatprep.subr.bf16.mxu0 %v2243_v30  ;;  %1971 = vmatprep.mubr.msk.f32.mxu1 %vm2245_vm13, %v3162_v63 }
 0x7c9   :  { %1994 = vmatpush3.bf16.msra.mxu1 %v1993_v25  ;;  %v1559_v25 = vld [vmem:[%s3119_s9] sm:$0xff] }
 0x7ca   :  { %1995 = vmatprep.subr.bf16.mxu1 %v2243_v30 }
 0x7cd   :  { %1997 = vmatpush3.bf16.msra.mxu1 %v1996_v26 }
 0x7ce   :  { %1925 = vmatmul.mubr.msk.f32.vlgmr.msra.gmra.mrb[48].mxu0 %vm1380_vm14, %v1370_v19  ;;  %1998 = vmatprep.subr.bf16.mxu1 %v2243_v30 }
 0x7cf   :  { %1931 = vmatprep.mubr.msk.f32.mxu0 %vm2245_vm13, %v3162_v63  ;;  %1991 = vmatpush3.bf16.msra.mxu0 %v1990_v21 }
 0x7d0   :  { %1934 = vmatprep.subr.mxu0 %v3162_v63 }
 0x7d1   :  { %2000 = vmatpush3.bf16.msra.mxu1 %v1999_v56 }
 0x7d2   :  { %2001 = vmatprep.subr.bf16.mxu1 %v2243_v30 }
 0x7d5   :  { %2003 = vmatpush3.bf16.msra.mxu1 %v2002_v9  ;;  %v2017_v9 = vpack.c.bf16 %v1714_v4, %v1713_v1 }
 0x7d6   :  { %2004 = vmatprep.subr.bf16.mxu1 %v2243_v30 }
 0x7d9   :  { %2006 = vmatpush3.bf16.msra.mxu1 %v2005_v11 }
 0x7da   :  { %2007 = vmatprep.subr.bf16.mxu1 %v2243_v30 }
 0x7dd   :  { %2009 = vmatpush3.bf16.msra.mxu1 %v2008_v39 }
 0x7de   :  { %2010 = vmatprep.subr.bf16.mxu1 %v2243_v30 }
 0x7e1   :  { %2012 = vmatpush3.bf16.msra.mxu1 %v2011_v31 }
 0x7e2   :  { %2013 = vmatprep.subr.bf16.mxu1 %v2243_v30 }
 0x7e5   :  { %2015 = vmatpush3.bf16.msra.mxu1 %v2014_v35 }
 0x899   :  { %v1294_v36 = vpop.f32.mrb[44].mxu0  ;;  %v1335_v41 = vpop.f32.mrb[44].mxu1 }
 0x89a   :  { %v1342_v44 = vadd.f32 %v1294_v36, %v3163_v42  ;;  %v1344_v46 = vadd.f32 %v1335_v41, %v3164_v45  ;;  %v1296_v47 = vpop.f32.mrb[45].mxu0  ;;  %v1337_v48 = vpop.f32.mrb[45].mxu1 }
 0x89b   :  { %v1343_v54 = vadd.f32 %v1296_v47, %v3165_v49  ;;  %v1345_v57 = vadd.f32 %v1337_v48, %v3166_v55  ;;  %v1298_v58 = vpop.f32.mrb[46].mxu0  ;;  %v1339_v59 = vpop.f32.mrb[46].mxu1 }
 0x89c   :  { %v1878_v60 = vmul.f32 -1.442695, %v1342_v44  ;;  %v1299_v61 = vpop.f32.mrb[47].mxu0  ;;  %v1340_v62 = vpop.f32.mrb[47].mxu1  ;;  %v1880_v29 = vmul.f32 -1.442695, %v1344_v46 }
 0x89d   :  { %v1879_v2 = vmul.f32 -1.442695, %v1343_v54 }
 0x89e   :  { %2193 = vpow2.f32 %v1878_v60 }
 0x89f   :  { %2195 = vpow2.f32 %v1879_v2 }
 0x8a0   :  { %2197 = vtanh.f32 %v1345_v57 }
 0x8a1   :  { %v1454_v5 = vpop.f32.mrb[48].mxu0  ;;  %2199 = vpow2.f32 %v1880_v29 }
 0x8a2   :  { %v1455_v6 = vadd.f32 %v1881_v3, %v1454_v5  ;;  %v1926_v7 = vpop.f32.mrb[49].mxu0 }
 0x8a4   :  { %v1458_v8 = vmax.f32 %v1455_v6, 0.0 }
 0x8a6   :  { %1932 = vmatmul.mubr.msk.f32.vlgmr.msra.gmra.mrb[50].mxu0 %vm1468_vm15, %v1458_v8 }
 0x8a7   :  { %1936 = vmatprep.mubr.msk.f32.mxu0 %vm2245_vm13, %v3162_v63  ;;  %1935 = vmatpush3.msra.mxu0 %v1559_v25 }
 0x8a8   :  { %v2194_v40 = vpop.eup %2193  ;;  %2016 = vmatprep.subr.bf16.mxu0 %v2243_v30 }
 0x8a9   :  { %v1349_v43 = vadd.f32 1.0, %v2194_v40  ;;  %v2196_v13 = vpop.eup %2195 }
 0x8aa   :  { %v1355_v14 = vadd.f32 1.0, %v2196_v13  ;;  %v2198_v16 = vpop.eup %2197 }
 0x8ab   :  { %2201 = vrcp.f32 %v1349_v43  ;;  %v2200_v24 = vpop.eup %2199 }
 0x8ac   :  { %2203 = vrcp.f32 %v1355_v14  ;;  %v1361_v19 = vadd.f32 1.0, %v2200_v24 }
 0x8ae   :  { %2205 = vrcp.f32 %v1361_v19 }
 0x8b5   :  { %v2202_v17 = vpop.eup %2201 }
 0x8b6   :  { %v1366_v38 = vmul.f32 %v2202_v17, %v2198_v16  ;;  %v2204_v15 = vpop.eup %2203 }
 0x8b7   :  { %v1365_v20 = vmul.f32 %v2204_v15, %v2989_v32 }
 0x8b8   :  { %v2206_v21 = vpop.eup %2205 }
 0x8b9   :  { %v1367_v0 = vadd.f32 %v1366_v38, %v1365_v20 }
 0x8bb   :  { %2207 = vtanh.f32 %v1367_v0 }
 0x8c5   :  { %v2208_v23 = vpop.eup %2207 }
 0x8c6   :  { %v1369_v18 = vmul.f32 %v2208_v23, %v2206_v21 }
 0x8c8   :  { %1972 = vmatmul.mubr.f32.vlgmr.msra.gmra.mrb[48].mxu1 %v1369_v18 }
 0x979   :  { %v1538_v22 = vpop.f32.mrb[50].mxu0 }
 0x97a   :  { %v1539_v32 = vadd.f32 %v1884_v50, %v1538_v22  ;;  %v1933_v26 = vpop.f32.mrb[51].mxu0 }
 0x97c   :  { %v1542_v51 = vmax.f32 %v1539_v32, 0.0 }
 0x97e   :  { %1937 = vmatmul.mubr.msk.f32.vlgmr.msra.gmra.mrb[52].mxu0 %vm1560_vm0, %v1542_v51 }
 0x97f   :  { %1982 = vmatprep.mubr.msk.f32.mxu0 %vm2245_vm13, %v3162_v63  ;;  %2018 = vmatpush3.bf16.msra.mxu0 %v2017_v9  ;;  %v1716_v63 = vld [vmem:[%s3121_s11 + $0x18] sm:$0xff] }
 0x980   :  { %2019 = vmatprep.subr.bf16.mxu0 %v2243_v30  ;;  %v2020_v10 = vpack.c.bf16 %v1716_v63, %v1715_v52 }
 0x983   :  { %2021 = vmatpush3.bf16.msra.mxu0 %v2020_v10 }
 0x99b   :  { %v1700_v53 = vpop.f32.mrb[48].mxu1 }
 0x99c   :  { %v1973_v56 = vpop.f32.mrb[49].mxu1 }
 0xa51   :  { %v1630_v11 = vpop.f32.mrb[52].mxu0 }
 0xa52   :  { %v1701_v37 = vadd.f32 %v1700_v53, %v1630_v11  ;;  %v1938_v39 = vpop.f32.mrb[53].mxu0 }
 0xa54   :  { %v1711_v27 = vadd.f32 %v1887_v12, %v1701_v37 }
 0xa56   :  { %v1712_v30 = vmax.f32 %v1711_v27, 0.0 }
 0xa58   :  { %1983 = vmatmul.mubr.msk.f32.vlgmr.msra.gmra.mrb[54].mxu0 %vm1724_vm1, %v1712_v30 }
 0xb2b   :  { %v1794_v31 = vpop.f32.mrb[54].mxu0 }
 0xb2c   :  { %v1795_v33 = vadd.f32 %v1888_v28, %v1794_v31  ;;  %v1984_v34 = vpop.f32.mrb[55].mxu0 }
 0xb2e   :  { %1798 = vst [vmem:[%s3124_s13] sm:$0xff] %v1795_v33 }

</bundles_post_ra>
